<compile_context>
chip_gen: v6e
topology: v6e:2x2x1
jax: 0.10.0
libtpu: 0.0.40
codegen_flags: <defaults>
</compile_context>

<pallas_src>
import functools

import jax
import jax.numpy as jnp
from jax import lax
from jax.experimental import pallas as pl
from jax.experimental.pallas import tpu as pltpu

EPS = 1e-5
LRELU_SLOPE = 0.2


# ----------------------------------------------------------------------------
# helpers
# ----------------------------------------------------------------------------
def _round_up(n, m):
    return ((n + m - 1) // m) * m


def _pad2(x, m0, m1):
    r, c = x.shape
    pr, pc = _round_up(r, m0) - r, _round_up(c, m1) - c
    if pr == 0 and pc == 0:
        return x
    return jnp.pad(x, ((0, pr), (0, pc)))


def _pick_tile(n, candidates):
    for c in candidates:
        if n % c == 0:
            return c
    return candidates[-1]


def _apply_act(y, act):
    if act == "none":
        return y
    if act == "lrelu":
        return jnp.where(y >= 0, y, LRELU_SLOPE * y)
    if act == "relu":
        return jnp.maximum(y, 0.0)
    if act == "tanh":
        return jnp.tanh(y)
    raise ValueError(act)


# ----------------------------------------------------------------------------
# Pallas kernels
# ----------------------------------------------------------------------------
def matmul_stats_kernel(a_ref, b_ref, bias_ref, o_ref, sum_ref, sq_ref,
                        acc_ref, *, nk, act):
    """Tiled GEMM (bf16 in, f32 accumulate) with fused bias+activation epilogue
    and fused per-channel sum / sum-of-squares (BatchNorm batch statistics).

    Grid is (j, i, k) with j = output-column tiles outermost so the (1, TN)
    stats blocks stay resident in VMEM across the whole i,k sweep.
    """
    i = pl.program_id(1)
    k = pl.program_id(2)

    @pl.when(k == 0)
    def _():
        acc_ref[...] = jnp.zeros_like(acc_ref)

    @pl.when(jnp.logical_and(i == 0, k == 0))
    def _():
        sum_ref[...] = jnp.zeros_like(sum_ref)
        sq_ref[...] = jnp.zeros_like(sq_ref)

    acc_ref[...] += jnp.dot(a_ref[...], b_ref[...],
                            preferred_element_type=jnp.float32)

    @pl.when(k == nk - 1)
    def _():
        y = acc_ref[...]
        # stats on the raw (pre-bias / pre-activation) conv output, in f32
        sum_ref[...] += jnp.sum(y, axis=0, keepdims=True)
        sq_ref[...] += jnp.sum(y * y, axis=0, keepdims=True)
        o_ref[...] = _apply_act(y + bias_ref[...], act).astype(o_ref.dtype)


def bn_act_drop_kernel(y_ref, scale_ref, shift_ref, o_ref, *, act, dropout,
                       seed):
    """Folded BatchNorm (y*scale + shift), activation, optional dropout p=0.5.

    Dropout mask comes from a murmur-style integer hash of the global element
    index + static per-layer/parity seed (runs on both Mosaic and interpret).
    """
    y = y_ref[...].astype(jnp.float32) * scale_ref[...] + shift_ref[...]
    y = _apply_act(y, act)
    if dropout:
        tm, tn = y.shape
        r = lax.broadcasted_iota(jnp.int32, (tm, tn), 0) + pl.program_id(0) * tm
        c = lax.broadcasted_iota(jnp.int32, (tm, tn), 1) + pl.program_id(1) * tn
        h = r * jnp.int32(7919) + c + jnp.int32(seed)
        h = (h ^ jnp.right_shift(h, 16)) * jnp.int32(-2048144789)
        h = (h ^ jnp.right_shift(h, 13)) * jnp.int32(-1028477387)
        h = h ^ jnp.right_shift(h, 16)
        keep = h >= 0                                    # P(keep) = 0.5
        y = jnp.where(keep, y * 2.0, jnp.zeros_like(y))  # inverted dropout
    o_ref[...] = y.astype(o_ref.dtype)


# ----------------------------------------------------------------------------
# fused GEMM + BN-stats layer (conv / deconv hot path)
# ----------------------------------------------------------------------------
def fused_matmul(patches, w2, bias, act, out_dtype):
    """patches [M,K] @ w2 [K,Cout] (+bias) -> act, plus per-column sum/sumsq.

    Returns (y_padded [Mp,Np], col_sum [Np], col_sq [Np], Mp, Np).
    Zero-padded rows of `patches` contribute exactly 0 to the stats as long as
    bias==None and act=='none' (the BN path).
    """
    M, K = patches.shape
    Cout = w2.shape[1]

    a = _pad2(patches.astype(jnp.bfloat16), 128, 128)
    b = _pad2(w2.astype(jnp.bfloat16), 128, 128)
    Mp, Kp = a.shape
    Np = b.shape[1]

    if bias is None:
        bias_p = jnp.zeros((1, Np), jnp.float32)
    else:
        bias_p = _pad2(bias.reshape(1, -1).astype(jnp.float32), 1, 128)

    TM = _pick_tile(Mp, (512, 256, 128))
    TN = _pick_tile(Np, (256, 128))
    TK = Kp if Kp <= 2048 else _pick_tile(Kp, (2048, 1024, 512, 256, 128))
    nk = Kp // TK

    y, sums, sqs = pl.pallas_call(
        functools.partial(matmul_stats_kernel, nk=nk, act=act),
        out_shape=(jax.ShapeDtypeStruct((Mp, Np), out_dtype),
                   jax.ShapeDtypeStruct((1, Np), jnp.float32),
                   jax.ShapeDtypeStruct((1, Np), jnp.float32)),
        grid_spec=pltpu.PrefetchScalarGridSpec(
            num_scalar_prefetch=0,
            grid=(Np // TN, Mp // TM, nk),           # (j, i, k)
            in_specs=[pl.BlockSpec((TM, TK), lambda j, i, k: (i, k)),
                      pl.BlockSpec((TK, TN), lambda j, i, k: (k, j)),
                      pl.BlockSpec((1, TN), lambda j, i, k: (0, j))],
            out_specs=(pl.BlockSpec((TM, TN), lambda j, i, k: (i, j)),
                       pl.BlockSpec((1, TN), lambda j, i, k: (0, j)),
                       pl.BlockSpec((1, TN), lambda j, i, k: (0, j))),
            scratch_shapes=[pltpu.VMEM((TM, TN), jnp.float32)]),
        compiler_params=pltpu.CompilerParams(
            dimension_semantics=("parallel", "arbitrary", "arbitrary"),
            vmem_limit_bytes=48 * 1024 * 1024),
    )(a, b, bias_p)
    return y, sums[0], sqs[0], Mp, Np


def bn_act_dropout(y, scale, shift, act, dropout, seed, out_dtype):
    Mp, Np = y.shape
    TM = _pick_tile(Mp, (512, 256, 128))
    TN = _pick_tile(Np, (256, 128))
    return pl.pallas_call(
        functools.partial(bn_act_drop_kernel, act=act, dropout=dropout,
                          seed=int(seed)),
        out_shape=jax.ShapeDtypeStruct((Mp, Np), out_dtype),
        grid_spec=pltpu.PrefetchScalarGridSpec(
            num_scalar_prefetch=0,
            grid=(Mp // TM, Np // TN),
            in_specs=[pl.BlockSpec((TM, TN), lambda i, j: (i, j)),
                      pl.BlockSpec((1, TN), lambda i, j: (0, j)),
                      pl.BlockSpec((1, TN), lambda i, j: (0, j))],
            out_specs=pl.BlockSpec((TM, TN), lambda i, j: (i, j))),
        compiler_params=pltpu.CompilerParams(
            dimension_semantics=("parallel", "parallel")),
    )(y, scale.reshape(1, Np).astype(jnp.float32),
      shift.reshape(1, Np).astype(jnp.float32))


def _fold_bn(csum, csq, count, gamma, beta, cout, np_):
    # TODO(synk): E[x^2]-E[x]^2 in f32 can lose precision for huge counts; a
    # shifted/two-pass variance would be more robust.
    mean = csum / count
    var = jnp.maximum(csq / count - mean * mean, 0.0)
    gamma_p = jnp.pad(gamma.astype(jnp.float32), (0, np_ - cout))
    beta_p = jnp.pad(beta.astype(jnp.float32), (0, np_ - cout))
    scale = gamma_p * lax.rsqrt(var + EPS)
    shift = beta_p - mean * scale
    return scale, shift


# ----------------------------------------------------------------------------
# conv / deconv layers (NHWC, im2col glue + fused Pallas GEMM)
# ----------------------------------------------------------------------------
def im2col_nhwc(x, K, stride, pad):
    """x NHWC -> patches [N*OH*OW, K*K*C], column order (kh, kw, c)."""
    N, H, W, C = x.shape
    xp = jnp.pad(x, ((0, 0), (pad, pad), (pad, pad), (0, 0)))
    OH = (H + 2 * pad - K) // stride + 1
    OW = (W + 2 * pad - K) // stride + 1
    cols = []
    for kh in range(K):
        for kw in range(K):
            cols.append(xp[:, kh:kh + (OH - 1) * stride + 1:stride,
                           kw:kw + (OW - 1) * stride + 1:stride, :])
    p = jnp.concatenate(cols, axis=-1)
    return p.reshape(N * OH * OW, K * K * C), OH, OW


def conv_layer(x, w, b, gamma, beta, act, use_bn):
    """Conv2d(k=4, s=2, p=1) [+BN] + activation.  x NHWC, w (Cout,Cin,4,4)."""
    N = x.shape[0]
    Cout = w.shape[0]
    patches, OH, OW = im2col_nhwc(x, 4, 2, 1)
    M = patches.shape[0]
    w2 = w.transpose(2, 3, 1, 0).reshape(-1, Cout)       # rows = (kh, kw, cin)
    if use_bn:
        # bias is cancelled by BN mean subtraction; keep padded rows exactly 0
        y, csum, csq, Mp, Np = fused_matmul(patches, w2, None, "none",
                                            jnp.bfloat16)
        scale, shift = _fold_bn(csum, csq, M, gamma, beta, Cout, Np)
        y = bn_act_dropout(y, scale, shift, act, False, 0, jnp.bfloat16)
    else:
        y, _, _, Mp, Np = fused_matmul(patches, w2, b, act, jnp.bfloat16)
    return y[:M, :Cout].reshape(N, OH, OW, Cout)


def deconv_layer(x, w, gamma, beta, act, dropout, seed,
                 out_dtype=jnp.bfloat16):
    """ConvTranspose2d(k=4, s=2, p=1, bias=False) + BN + act [+dropout p=0.5].

    x NHWC, w (Cin, Cout, 4, 4).  Decomposed into 4 stride-1 2x2 sub-convs
    (one per output parity); BN stats are combined over all 4 parities so they
    equal the full-output batch statistics.
    """
    N, H, W, C = x.shape
    Cin, Cout = w.shape[0], w.shape[1]
    xp = jnp.pad(x, ((0, 0), (1, 1), (1, 1), (0, 0)))
    M = N * H * W

    parity_y = []
    csum = 0.0
    csq = 0.0
    Np = None
    for a in (0, 1):
        for b in (0, 1):
            cols = []
            for dy in (0, 1):
                for dx in (0, 1):
                    cols.append(xp[:, a + dy:a + dy + H, b + dx:b + dx + W, :])
            patches = jnp.concatenate(cols, axis=-1).reshape(M, 4 * C)
            # sub-kernel taps: kh = (3-a)-2*dy, kw = (3-b)-2*dx
            sub = w[:, :, (3 - a)::-2, (3 - b)::-2]       # (Cin, Cout, 2, 2)
            w2 = sub.transpose(2, 3, 0, 1).reshape(4 * Cin, Cout)
            y, s1, s2, Mp, Np = fused_matmul(patches, w2, None, "none",
                                             jnp.bfloat16)
            parity_y.append(y)
            csum = csum + s1
            csq = csq + s2

    scale, shift = _fold_bn(csum, csq, 4 * M, gamma, beta, Cout, Np)

    outs = []
    for idx, y in enumerate(parity_y):
        kseed = ((seed * 4 + idx) * 2654435761 + 1013904223) % (2 ** 31)
        o = bn_act_dropout(y, scale, shift, act, dropout, kseed, out_dtype)
        outs.append(o[:M, :Cout].reshape(N, H, W, Cout))

    # interleave parities: y[n, 2m+a, 2p+b, c] = outs[(a,b)][n, m, p, c]
    y = jnp.stack(outs, axis=3).reshape(N, H, W, 2, 2, Cout)
    y = y.transpose(0, 1, 3, 2, 4, 5).reshape(N, 2 * H, 2 * W, Cout)
    return y


# ----------------------------------------------------------------------------
# Generator
# ----------------------------------------------------------------------------
CONV_CFG = [(3, 64, False), (64, 128, True), (128, 256, True), (256, 512, True),
            (512, 512, True), (512, 512, True), (512, 512, True),
            (512, 512, False)]
# (cin, cout, activation, dropout-after)
DECONV_CFG = [(512, 512, "relu", True), (1024, 512, "relu", True),
              (1024, 512, "relu", True), (1024, 512, "relu", False),
              (1024, 256, "relu", False), (512, 128, "relu", False),
              (256, 64, "relu", False), (128, 3, "tanh", False)]


def init_params(key):
    params = {}
    keys = jax.random.split(key, 2 * (len(CONV_CFG) + len(DECONV_CFG)))
    ki = 0
    for i, (cin, cout, bn) in enumerate(CONV_CFG):
        p = {"w": jax.random.normal(keys[ki], (cout, cin, 4, 4),
                                    jnp.float32) * 0.02,
             "b": jax.random.normal(keys[ki + 1], (cout,), jnp.float32) * 0.02}
        ki += 2
        if bn:
            p["gamma"] = jnp.ones((cout,), jnp.float32)
            p["beta"] = jnp.zeros((cout,), jnp.float32)
        params["conv%d" % (i + 1)] = p
    for i, (cin, cout, act, drop) in enumerate(DECONV_CFG):
        p = {"w": jax.random.normal(keys[ki], (cin, cout, 4, 4),
                                    jnp.float32) * 0.02,
             "gamma": jnp.ones((cout,), jnp.float32),
             "beta": jnp.zeros((cout,), jnp.float32)}
        ki += 2
        params["deconv%d" % (i + 1)] = p
    return params


def generator_forward(params, x_nchw, train=True, seed=0):
    # NCHW -> NHWC once at entry (3 channels, cheap); bf16 activations.
    h = x_nchw.transpose(0, 2, 3, 1).astype(jnp.bfloat16)

    # encoder
    enc = []
    for i, (cin, cout, bn) in enumerate(CONV_CFG):
        p = params["conv%d" % (i + 1)]
        h = conv_layer(h, p["w"], p["b"], p.get("gamma"), p.get("beta"),
                       act="lrelu", use_bn=bn)
        enc.append(h)
    e1, e2, e3, e4, e5, e6, e7, e8 = enc

    # decoder with skip connections (concat along channel axis = last in NHWC)
    skips = [None, e7, e6, e5, e4, e3, e2, e1]
    d = e8
    for i, (cin, cout, act, drop) in enumerate(DECONV_CFG):
        p = params["deconv%d" % (i + 1)]
        inp = d if skips[i] is None else jnp.concatenate([d, skips[i]], axis=-1)
        last = (i == len(DECONV_CFG) - 1)
        d = deconv_layer(inp, p["w"], p["gamma"], p["beta"], act=act,
                         dropout=(drop and train), seed=seed + 1000 * i,
                         out_dtype=jnp.float32 if last else jnp.bfloat16)
    return d.transpose(0, 3, 1, 2)     # back to NCHW like the PyTorch module


if __name__ == "__main__":
    key = jax.random.PRNGKey(0)
    pkey, xkey = jax.random.split(key)
    params = init_params(pkey)

    # smallest spatial size consistent with the 8-level U-Net (2^8 = 256)
    x = jax.random.normal(xkey, (1, 3, 256, 256), jnp.float32)

    y = generator_forward(params, x, train=True, seed=1234)
    y = jax.block_until_ready(y)

    assert y.shape == (1, 3, 256, 256), y.shape
    assert bool(jnp.all(jnp.isfinite(y)))
    print("KERNEL_OK")
</pallas_src>

<mosaic_0001>
module attributes {stable_mosaic.version = 11 : i64} {
  func.func @matmul_stats_kernel(%arg0: i32, %arg1: i32, %arg2: i32, %arg3: memref<512x128xbf16, #tpu.memory_space<vmem>>, %arg4: memref<128x128xbf16, #tpu.memory_space<vmem>>, %arg5: memref<1x128xf32, #tpu.memory_space<vmem>>, %arg6: memref<512x128xbf16, #tpu.memory_space<vmem>>, %arg7: memref<1x128xf32, #tpu.memory_space<vmem>>, %arg8: memref<1x128xf32, #tpu.memory_space<vmem>>, %arg9: memref<512x128xf32, #tpu.memory_space<vmem>>) attributes {dimension_semantics = [#tpu.dimension_semantics<parallel>, #tpu.dimension_semantics<arbitrary>, #tpu.dimension_semantics<arbitrary>], iteration_bounds = array<i64: 1, 32, 1>, scalar_prefetch = 0 : i64, scratch_operands = 1 : i64, tpu.core_type = #tpu.core_type<tc>, window_params = [{transform_indices = @transform_0, window_bounds = array<i64: 512, 128>}, {transform_indices = @transform_1, window_bounds = array<i64: 128, 128>}, {transform_indices = @transform_2, window_bounds = array<i64: 1, 128>}, {transform_indices = @transform_3, window_bounds = array<i64: 512, 128>}, {transform_indices = @transform_4, window_bounds = array<i64: 1, 128>}, {transform_indices = @transform_5, window_bounds = array<i64: 1, 128>}]} {
    %c0_i32 = arith.constant 0 : i32
    %0 = arith.cmpi eq, %arg2, %c0_i32 : i32
    %1 = arith.extui %0 : i1 to i32
    %c0_i32_0 = arith.constant 0 : i32
    %2 = arith.cmpi ne, %1, %c0_i32_0 : i32
    scf.if %2 {
      %cst_13 = arith.constant 0.000000e+00 : f32
      %17 = vector.broadcast %cst_13 : f32 to vector<512x128xf32>
      %c0_14 = arith.constant 0 : index
      %c0_15 = arith.constant 0 : index
      %18 = vector.load %arg9[%c0_14, %c0_15] : memref<512x128xf32, #tpu.memory_space<vmem>>, vector<512x128xf32>
      tpu.vector_store %arg9[%c0_14, %c0_15], %17 {strides = array<i32>} : memref<512x128xf32, #tpu.memory_space<vmem>>, vector<512x128xf32>,
    } else {
    }
    %c0_i32_1 = arith.constant 0 : i32
    %3 = arith.cmpi eq, %arg1, %c0_i32_1 : i32
    %c0_i32_2 = arith.constant 0 : i32
    %4 = arith.cmpi eq, %arg2, %c0_i32_2 : i32
    %5 = arith.andi %3, %4 : i1
    %6 = arith.extui %5 : i1 to i32
    %c0_i32_3 = arith.constant 0 : i32
    %7 = arith.cmpi ne, %6, %c0_i32_3 : i32
    scf.if %7 {
      %cst_13 = arith.constant 0.000000e+00 : f32
      %17 = vector.broadcast %cst_13 : f32 to vector<1x128xf32>
      %c0_14 = arith.constant 0 : index
      %c0_15 = arith.constant 0 : index
      %18 = vector.load %arg7[%c0_14, %c0_15] : memref<1x128xf32, #tpu.memory_space<vmem>>, vector<1x128xf32>
      tpu.vector_store %arg7[%c0_14, %c0_15], %17 {strides = array<i32>} : memref<1x128xf32, #tpu.memory_space<vmem>>, vector<1x128xf32>,
      %cst_16 = arith.constant 0.000000e+00 : f32
      %19 = vector.broadcast %cst_16 : f32 to vector<1x128xf32>
      %c0_17 = arith.constant 0 : index
      %c0_18 = arith.constant 0 : index
      %20 = vector.load %arg8[%c0_17, %c0_18] : memref<1x128xf32, #tpu.memory_space<vmem>>, vector<1x128xf32>
      tpu.vector_store %arg8[%c0_17, %c0_18], %19 {strides = array<i32>} : memref<1x128xf32, #tpu.memory_space<vmem>>, vector<1x128xf32>,
    } else {
    }
    %c0 = arith.constant 0 : index
    %c0_4 = arith.constant 0 : index
    %8 = vector.load %arg9[%c0, %c0_4] : memref<512x128xf32, #tpu.memory_space<vmem>>, vector<512x128xf32>
    %c0_5 = arith.constant 0 : index
    %c0_6 = arith.constant 0 : index
    %9 = vector.load %arg3[%c0_5, %c0_6] : memref<512x128xbf16, #tpu.memory_space<vmem>>, vector<512x128xbf16>
    %c0_7 = arith.constant 0 : index
    %c0_8 = arith.constant 0 : index
    %10 = vector.load %arg4[%c0_7, %c0_8] : memref<128x128xbf16, #tpu.memory_space<vmem>>, vector<128x128xbf16>
    %cst = arith.constant dense<0.000000e+00> : vector<512x128xf32>
    %11 = tpu.matmul %9, %10, %cst {dimension_numbers = #tpu.dot_dimension_numbers<[1], [0], [0], [1], [0, 0, 1, 1], [], []>} : vector<512x128xbf16>, vector<128x128xbf16>, vector<512x128xf32> -> vector<512x128xf32>
    %12 = arith.addf %8, %11 : vector<512x128xf32>
    %c0_9 = arith.constant 0 : index
    %c0_10 = arith.constant 0 : index
    %13 = vector.load %arg9[%c0_9, %c0_10] : memref<512x128xf32, #tpu.memory_space<vmem>>, vector<512x128xf32>
    tpu.vector_store %arg9[%c0_9, %c0_10], %12 {strides = array<i32>} : memref<512x128xf32, #tpu.memory_space<vmem>>, vector<512x128xf32>,
    %c0_i32_11 = arith.constant 0 : i32
    %14 = arith.cmpi eq, %arg2, %c0_i32_11 : i32
    %15 = arith.extui %14 : i1 to i32
    %c0_i32_12 = arith.constant 0 : i32
    %16 = arith.cmpi ne, %15, %c0_i32_12 : i32
    scf.if %16 {
      %c0_13 = arith.constant 0 : index
      %c0_14 = arith.constant 0 : index
      %17 = vector.load %arg9[%c0_13, %c0_14] : memref<512x128xf32, #tpu.memory_space<vmem>>, vector<512x128xf32>
      %c0_15 = arith.constant 0 : index
      %c0_16 = arith.constant 0 : index
      %18 = vector.load %arg7[%c0_15, %c0_16] : memref<1x128xf32, #tpu.memory_space<vmem>>, vector<1x128xf32>
      %cst_17 = arith.constant dense<0.000000e+00> : vector<128xf32>
      %19 = vector.multi_reduction <add>, %17, %cst_17 [0] : vector<512x128xf32> to vector<128xf32>
      %20 = vector.shape_cast %19 : vector<128xf32> to vector<1x128xf32>
      %21 = arith.addf %18, %20 : vector<1x128xf32>
      %c0_18 = arith.constant 0 : index
      %c0_19 = arith.constant 0 : index
      %22 = vector.load %arg7[%c0_18, %c0_19] : memref<1x128xf32, #tpu.memory_space<vmem>>, vector<1x128xf32>
      tpu.vector_store %arg7[%c0_18, %c0_19], %21 {strides = array<i32>} : memref<1x128xf32, #tpu.memory_space<vmem>>, vector<1x128xf32>,
      %c0_20 = arith.constant 0 : index
      %c0_21 = arith.constant 0 : index
      %23 = vector.load %arg8[%c0_20, %c0_21] : memref<1x128xf32, #tpu.memory_space<vmem>>, vector<1x128xf32>
      %24 = arith.mulf %17, %17 : vector<512x128xf32>
      %cst_22 = arith.constant dense<0.000000e+00> : vector<128xf32>
      %25 = vector.multi_reduction <add>, %24, %cst_22 [0] : vector<512x128xf32> to vector<128xf32>
      %26 = vector.shape_cast %25 : vector<128xf32> to vector<1x128xf32>
      %27 = arith.addf %23, %26 : vector<1x128xf32>
      %c0_23 = arith.constant 0 : index
      %c0_24 = arith.constant 0 : index
      %28 = vector.load %arg8[%c0_23, %c0_24] : memref<1x128xf32, #tpu.memory_space<vmem>>, vector<1x128xf32>
      tpu.vector_store %arg8[%c0_23, %c0_24], %27 {strides = array<i32>} : memref<1x128xf32, #tpu.memory_space<vmem>>, vector<1x128xf32>,
      %c0_25 = arith.constant 0 : index
      %c0_26 = arith.constant 0 : index
      %29 = vector.load %arg5[%c0_25, %c0_26] : memref<1x128xf32, #tpu.memory_space<vmem>>, vector<1x128xf32>
      %30 = vector.broadcast %29 : vector<1x128xf32> to vector<512x128xf32>
      %31 = arith.addf %17, %30 : vector<512x128xf32>
      %cst_27 = arith.constant 0.000000e+00 : f32
      %32 = vector.broadcast %cst_27 : f32 to vector<512x128xf32>
      %33 = arith.cmpf oge, %31, %32 : vector<512x128xf32>
      %cst_28 = arith.constant 2.000000e-01 : f32
      %34 = vector.broadcast %cst_28 : f32 to vector<512x128xf32>
      %35 = arith.mulf %34, %31 : vector<512x128xf32>
      %36 = arith.select %33, %31, %35 : vector<512x128xi1>, vector<512x128xf32>
      %37 = arith.truncf %36 : vector<512x128xf32> to vector<512x128xbf16>
      %c0_29 = arith.constant 0 : index
      %c0_30 = arith.constant 0 : index
      %38 = vector.load %arg6[%c0_29, %c0_30] : memref<512x128xbf16, #tpu.memory_space<vmem>>, vector<512x128xbf16>
      tpu.vector_store %arg6[%c0_29, %c0_30], %37 {strides = array<i32>} : memref<512x128xbf16, #tpu.memory_space<vmem>>, vector<512x128xbf16>,
    } else {
    }
    return
  }
  func.func @transform_0(%arg0: i32, %arg1: i32, %arg2: i32) -> (i32, i32) {
    %c0_i32 = arith.constant 0 : i32
    return %arg1, %arg2 : i32, i32
  }
  func.func @transform_1(%arg0: i32, %arg1: i32, %arg2: i32) -> (i32, i32) {
    %c0_i32 = arith.constant 0 : i32
    return %arg2, %arg0 : i32, i32
  }
  func.func @transform_2(%arg0: i32, %arg1: i32, %arg2: i32) -> (i32, i32) {
    %c0_i32 = arith.constant 0 : i32
    %c0_i32_0 = arith.constant 0 : i32
    return %c0_i32, %arg0 : i32, i32
  }
  func.func @transform_3(%arg0: i32, %arg1: i32, %arg2: i32) -> (i32, i32) {
    %c0_i32 = arith.constant 0 : i32
    return %arg1, %arg0 : i32, i32
  }
  func.func @transform_4(%arg0: i32, %arg1: i32, %arg2: i32) -> (i32, i32) {
    %c0_i32 = arith.constant 0 : i32
    %c0_i32_0 = arith.constant 0 : i32
    return %c0_i32, %arg0 : i32, i32
  }
  func.func @transform_5(%arg0: i32, %arg1: i32, %arg2: i32) -> (i32, i32) {
    %c0_i32 = arith.constant 0 : i32
    %c0_i32_0 = arith.constant 0 : i32
    return %c0_i32, %arg0 : i32, i32
  }
}

</mosaic_0001>

<bundles_post_ra>
// kernel: tpu_custom_call.1
= control target key start
LH: loop header
LB: loop body
LE: loop exit
PB: predicated region body
PF: predicated region fallthrough
CT: control target
= control target key end

     0   :  { %s3947_s0 = inlined_call_operand.hbm [shape: bf16[16384,128], index: 0, kind: input, shape index: {}]   ;;  %s3948_s1 = inlined_call_operand.hbm [shape: bf16[128,128], index: 1, kind: input, shape index: {}]   ;;  %s3949_s2 = inlined_call_operand.hbm [shape: f32[1,128], index: 2, kind: input, shape index: {}]   ;;  %s3950_s3 = inlined_call_operand.hbm [shape: bf16[16384,128], index: 3, kind: output, shape index: {0}]   ;;  %s3951_s4 = inlined_call_operand.hbm [shape: f32[1,128], index: 4, kind: output, shape index: {1}]   ;;  %s3952_s5 = inlined_call_operand.hbm [shape: f32[1,128], index: 5, kind: output, shape index: {2}]  }
   0x1   :  { %3957 = sst [smem:[#allocation17_spill]] %s3948_s1 }
   0x2   :  { %3958 = sst [smem:[#allocation18_spill]] %s3949_s2 }
   0x3   :  { %11 = vsyncpa [#allocation4], 0 }
   0x4   :  { %13 = vsyncpa [#allocation4 + $0x1], 0 }
   0x5   :  { %14 = vsyncpa [#allocation7], 0 }
   0x6   :  { %15 = vsyncpa [#allocation5], 0 }
   0x7   :  { %17 = vsyncpa [#allocation5 + $0x1], 0 }
   0x8   :  { %18 = vsyncpa [#allocation11], 0  ;;  %s3162_s18 = smov 0   ;;  %s3164_s19 = smov 0  }
   0x9   :  { %s3166_s20 = smov 0   ;;  %s3168_s21 = smov 0  }
   0xa   :  { %s3170_s22 = smov 0   ;;  %s3172_s23 = smov 0  }
   0xb LB: > { %s2235_s24 = sadd.s32 4294967295, %s3118_s23   ;;  %s2236_s25 = sadd.s32 4294967294, %s3118_s23   ;;  %s3118_s23 = sphi %s3172_s23, %s24_s23   ;;  %s3114_s22 = sphi %s3170_s22, %s3977_s22   ;;  %s3110_s21 = sphi %s3168_s21, %s3976_s21   ;;  %s3106_s20 = sphi %s3166_s20, %s3975_s20   ;;  %s3102_s19 = sphi %s3164_s19, %s3974_s19   ;;  %s3098_s18 = sphi %s3162_s18, %s3973_s18  }
   0xc   : > { %p65_p0 = scmp.ne.s32.totalorder %s3102_s19, %s3098_s18  ;;  %p3196_p1 = scmp.eq.s32.totalorder %s2235_s24, 0 }
   0xd   : > { %p3200_p2 = scmp.eq.s32.totalorder %s2235_s24, 31  ;;  %p151_p3 = scmp.eq.s32.totalorder %s2236_s25, 31 }
   0xe   : > { %p3206_p4 = por %p3196_p1, %p65_p0  ;;  %p2237_p5 = scmp.ge.s32.totalorder %s3118_s23, 1 }
   0xf   : > { %s3960_s27 = scalar_select %p3200_p2, 1, 0 }
  0x10   : > { %p3211_p6 = por %p151_p3, %p65_p0  ;;  %p210_p7 = scmp.lt.s32.totalorder %s3118_s23, 33 }
  0x11   : > { %s3120_s6 = smov [#allocation6]   ;;  %s3121_s9 = smov [#allocation8]  }
  0x12   : > { %s3962_s29 = scalar_select %p3211_p6, 1, 0 }
  0x13   : > { %p3216_p8 = pnand %p2237_p5, %p210_p7  ;;  %s226_s7 = sshll.u32 %s3120_s6, 4  ;;  %s227_s7 = int_to_ptr.vmem [resolvable:$true] %s226_s7 }
  0x14   : > { %s242_s10 = sshll.u32 %s3121_s9, 4  ;;  %s2913_s11 = scalar_lea.vmem %s227_s7, 1024  ;;  %s243_s10 = int_to_ptr.vmem [resolvable:$true] %s242_s10 }
  0x15   : > { %p2778_p9 = pneg %p3216_p8  ;;  %p2914_p12 = scmp.ne.s32.totalorder %s227_s7, %s2913_s11 }
  0x16   : > { %p2921_p3 = scmp.lt.s32.totalorder %s227_s7, %s227_s7  ;;  %p2922_p5 = scmp.lt.s32.totalorder %s2913_s11, %s2913_s11 }
  0x17   : > { %p3224_p10 = pnand %p2778_p9, %p3196_p1 }
  0x18   : > { %p2923_p7 = por %p2922_p5, %p2921_p3 }
  0x19   : > { %p2904_p11 = pneg %p3224_p10 }
  0x1b   : > { %p2916_p13 = pnand %p2914_p12, %p2904_p11 }
  0x1d   : > { %p2917_p0 = pneg %p2916_p13 }
  0x1f   : > { %p2924_p9 = pnand %p2923_p7, %p2917_p0 }
  0x21   : > { %2927 = shalt.err (!%p2924_p9)
}
  0x22   : > { %s3953_s12 = smov 64   ;;  %s3954_s13 = smov 4  }
  0x23   : > { %s3965_s1 = sld [smem:[#allocation17_spill]]  ;;  %s2939_s16 = scalar_lea.vmem %s243_s10, 16 }
  0x24   : > { %p2940_p12 = scmp.ne.s32.totalorder %s243_s10, %s2939_s16  ;;  %s2946_s17 = scalar_lea.vmem %s243_s10, 32 }
  0x25   : > { %p2947_p0 = scmp.lt.s32.totalorder %s243_s10, %s243_s10  ;;  %p2948_p5 = scmp.lt.s32.totalorder %s2946_s17, %s2939_s16 }
  0x26   : > { %p2942_p13 = pnand %p2940_p12, %p2904_p11 }
  0x27   : > { %p2949_p7 = por %p2948_p5, %p2947_p0 }
  0x28   : > { %p2943_p3 = pneg %p2942_p13 }
  0x29   : > { %2781 = dma.hbm_to_vmem [thread:$0]  (!%p3224_p10), %s3965_s1, 1024, %s227_s7, [#allocation7], %s3953_s12, %s3953_s12, %s3954_s13  }
  0x2a   : > { %p2950_p9 = pnand %p2949_p7, %p2943_p3 }
  0x2c   : > { %2953 = shalt.err (!%p2950_p9)
}
  0x2d   : > { %s3966_s2 = sld [smem:[#allocation18_spill]]  ;;  %s39_s6 = sadd.s32 1, %s3114_s22 }
  0x2e   : > { %s52_s7 = sadd.s32 1, %s3106_s20  ;;  %p41_p11 = scmp.ge.s32.totalorder %s39_s6, 32 }
  0x2f   : > { %p59_p12 = scmp.ne.s32.totalorder %s3106_s20, %s3102_s19  ;;  %p60_p13 = scmp.eq.s32.totalorder %s3118_s23, 0 }
  0x30   : > { %p2795_p3 = scmp.lt.s32.totalorder %s3118_s23, 32  ;;  %s3979_s6 = smov (%p41_p11, %s39_s6), 0 }
  0x31   : > { %p61_p0 = por %p60_p13, %p59_p12  ;;  %p3259_p5 = por %p3200_p2, %p59_p12 }
  0x32   : > { %s47_s9 = ssub.s32 %s3114_s22, %s3979_s6  ;;  %s253_s11 = sand.u32 1, %s3106_s20  }
  0x33   : > { %2784 = dma.hbm_to_vmem [thread:$0]  (!%p3224_p10), %s3966_s2, 16, %s243_s10, [#allocation7]  }
  0x34   : > { %p50_p7 = scmp.eq.s32.totalorder %s47_s9, 0  ;;  %s2241_s10 = sshll.u32 %s253_s11, 8 }
  0x35   : > { %s2364_s14 = sshll.u32 %s3114_s22, 12  ;;  %s257_s25 = scalar_lea.vmem [#allocation3], %s2241_s10 }
  0x36   : > { %s3268_s15 = scalar_select %p50_p7, %s3106_s20, %s52_s7  }
  0x37   : > { %s264_s24 = scalar_lea.hbm %s3947_s0, %s2364_s14  ;;  %s265_s12 = sshll.u32 %s257_s25, 4  ;;  %s266_s12 = int_to_ptr.vmem [resolvable:$true] %s265_s12 }
  0x38   : > { %p3275_p10 = pnand %p2795_p3, %p61_p0  ;;  %s254_s1 = scalar_lea.sflag [#allocation4], %s253_s11 }
  0x39   : > { %s2967_s9 = scalar_lea.vmem %s266_s12, 4096  ;;  %s3124_s7 = smov [#allocation3]  }
  0x3a   : > { %p2956_p9 = pneg %p3275_p10  ;;  %p2968_p11 = scmp.ne.s32.totalorder %s266_s12, %s2967_s9 }
  0x3b   : > { %s2972_s2 = sshll.u32 %s3124_s7, 4  ;;  %s2973_s2 = int_to_ptr.vmem [resolvable:$false] %s2972_s2 }
  0x3c   : > { %p2970_p12 = pnand %p2968_p11, %p2956_p9  ;;  %s2974_s14 = scalar_lea.vmem %s2973_s2, 8192 }
  0x3d   : > { %p2975_p7 = scmp.lt.s32.totalorder %s266_s12, %s2973_s2  ;;  %p2976_p6 = scmp.lt.s32.totalorder %s2974_s14, %s2967_s9 }
  0x3e   : > { %p2971_p13 = pneg %p2970_p12 }
  0x3f   : > { %p2977_p2 = por %p2976_p6, %p2975_p7 }
  0x41   : > { %p2978_p3 = pnand %p2977_p2, %p2971_p13 }
  0x43   : > { %2981 = shalt.err (!%p2978_p3)
}
  0x44   : > { %s3969_s10 = smov 4   ;;  %s3970_s16 = smov 64  }
  0x45   : > { %2788 = dma.hbm_to_vmem [thread:$0]  (!%p3275_p10), %s264_s24, 4096, %s266_s12, %s254_s1, %s3970_s16, %s3970_s16, %s3969_s10  }
  0x46   : > { %277 = sbr.rel (%p3216_p8) target bundleno = 530 (0x212), region = 32  ;;  %s3289_s11 = sand.u32 (!%p3216_p8), 1, %s3102_s19  }
  0x47   : > { %s2245_s2 = sshll.u32 (!%p3216_p8), %s3289_s11, 8  ;;  %s280_s17 = scalar_lea.sflag (!%p3216_p8), [#allocation4], %s3289_s11 }
  0x48   : > { %s3295_s25 = scalar_lea.vmem (!%p3216_p8), [#allocation3], %s2245_s2 }
  0x4b   : > { %3081 = dma.done.wait (%p3206_p4), %s280_s17, 4096  }
  0x4c   : > { %3083 = vsyncadd (%p3206_p4), %s280_s17, 4294963200 }
  0x4d   : > { %3085 = dma.done.wait (%p3196_p1), [#allocation7], 1040  }
  0x4e   : > { %3087 = vsyncadd (%p3196_p1), [#allocation7], 4294966256  ;;  %p390_p2 = scmp.eq.s32.totalorder %s3110_s21, 0  ;;  %v3125_v0 = vmov 0.0   ;;  %s3372_s1 = scalar_lea.vmem [#allocation9], %s2245_s2 }
  0x4f   : > { %326 = vst [vmem:[#allocation2 + $0xb0] sm:$0xff] %v3125_v0  ;;  %327 = vst [vmem:[#allocation2 + $0x1b0] sm:$0xff] %v3125_v0  ;;  %v3126_v1 = vmov (%p390_p2), 0.0  }
  0x50   : > { %328 = vst [vmem:[#allocation2 + $0xd8] sm:$0xff] %v3125_v0  ;;  %329 = vst [vmem:[#allocation2 + $0x18] sm:$0xff] %v3125_v0 }
  0x51   : > { %330 = vst [vmem:[#allocation2 + $0x50] sm:$0xff] %v3125_v0  ;;  %331 = vst [vmem:[#allocation2 + $0x168] sm:$0xff] %v3125_v0 }
  0x52   : > { %332 = vst [vmem:[#allocation2 + $0x130] sm:$0xff] %v3125_v0  ;;  %333 = vst [vmem:[#allocation2 + $0x48] sm:$0xff] %v3125_v0 }
  0x53   : > { %334 = vst [vmem:[#allocation2 + $0x180] sm:$0xff] %v3125_v0  ;;  %335 = vst [vmem:[#allocation2 + $0x110] sm:$0xff] %v3125_v0 }
  0x54   : > { %336 = vst [vmem:[#allocation2 + $0x118] sm:$0xff] %v3125_v0  ;;  %337 = vst [vmem:[#allocation2 + $0x98] sm:$0xff] %v3125_v0 }
  0x55   : > { %338 = vst [vmem:[#allocation2 + $0x120] sm:$0xff] %v3125_v0  ;;  %339 = vst [vmem:[#allocation2 + $0x150] sm:$0xff] %v3125_v0 }
  0x56   : > { %340 = vst [vmem:[#allocation2 + $0x108] sm:$0xff] %v3125_v0  ;;  %341 = vst [vmem:[#allocation2 + $0x60] sm:$0xff] %v3125_v0 }
  0x57   : > { %342 = vst [vmem:[#allocation2 + $0xe0] sm:$0xff] %v3125_v0  ;;  %343 = vst [vmem:[#allocation2 + $0x188] sm:$0xff] %v3125_v0 }
  0x58   : > { %344 = vst [vmem:[#allocation2 + $0x138] sm:$0xff] %v3125_v0  ;;  %345 = vst [vmem:[#allocation2 + $0x140] sm:$0xff] %v3125_v0 }
  0x59   : > { %346 = vst [vmem:[#allocation2 + $0x80] sm:$0xff] %v3125_v0  ;;  %347 = vst [vmem:[#allocation2 + $0x1a8] sm:$0xff] %v3125_v0 }
  0x5a   : > { %348 = vst [vmem:[#allocation2 + $0x1b8] sm:$0xff] %v3125_v0  ;;  %349 = vst [vmem:[#allocation2 + $0x28] sm:$0xff] %v3125_v0 }
  0x5b   : > { %350 = vst [vmem:[#allocation2 + $0x1e8] sm:$0xff] %v3125_v0  ;;  %351 = vst [vmem:[#allocation2 + $0xf8] sm:$0xff] %v3125_v0 }
  0x5c   : > { %352 = vst [vmem:[#allocation2 + $0x160] sm:$0xff] %v3125_v0  ;;  %353 = vst [vmem:[#allocation2 + $0x30] sm:$0xff] %v3125_v0 }
  0x5d   : > { %354 = vst [vmem:[#allocation2 + $0x1e0] sm:$0xff] %v3125_v0  ;;  %355 = vst [vmem:[#allocation2] sm:$0xff] %v3125_v0 }
  0x5e   : > { %356 = vst [vmem:[#allocation2 + $0xf0] sm:$0xff] %v3125_v0  ;;  %357 = vst [vmem:[#allocation2 + $0x8] sm:$0xff] %v3125_v0 }
  0x5f   : > { %358 = vst [vmem:[#allocation2 + $0x148] sm:$0xff] %v3125_v0  ;;  %359 = vst [vmem:[#allocation2 + $0x1d0] sm:$0xff] %v3125_v0 }
  0x60   : > { %360 = vst [vmem:[#allocation2 + $0x100] sm:$0xff] %v3125_v0  ;;  %361 = vst [vmem:[#allocation2 + $0xc8] sm:$0xff] %v3125_v0 }
  0x61   : > { %362 = vst [vmem:[#allocation2 + $0x40] sm:$0xff] %v3125_v0  ;;  %363 = vst [vmem:[#allocation2 + $0x1f8] sm:$0xff] %v3125_v0 }
  0x62   : > { %364 = vst [vmem:[#allocation2 + $0x20] sm:$0xff] %v3125_v0  ;;  %365 = vst [vmem:[#allocation2 + $0x128] sm:$0xff] %v3125_v0 }
  0x63   : > { %366 = vst [vmem:[#allocation2 + $0x1a0] sm:$0xff] %v3125_v0  ;;  %367 = vst [vmem:[#allocation2 + $0x1f0] sm:$0xff] %v3125_v0 }
  0x64   : > { %368 = vst [vmem:[#allocation2 + $0xe8] sm:$0xff] %v3125_v0  ;;  %369 = vst [vmem:[#allocation2 + $0x78] sm:$0xff] %v3125_v0 }
  0x65   : > { %370 = vst [vmem:[#allocation2 + $0x70] sm:$0xff] %v3125_v0  ;;  %371 = vst [vmem:[#allocation2 + $0x90] sm:$0xff] %v3125_v0 }
  0x66   : > { %372 = vst [vmem:[#allocation2 + $0x1d8] sm:$0xff] %v3125_v0  ;;  %373 = vst [vmem:[#allocation2 + $0xd0] sm:$0xff] %v3125_v0 }
  0x67   : > { %374 = vst [vmem:[#allocation2 + $0xb8] sm:$0xff] %v3125_v0  ;;  %375 = vst [vmem:[#allocation2 + $0x88] sm:$0xff] %v3125_v0 }
  0x68   : > { %376 = vst [vmem:[#allocation2 + $0xa8] sm:$0xff] %v3125_v0  ;;  %377 = vst [vmem:[#allocation2 + $0x1c8] sm:$0xff] %v3125_v0 }
  0x69   : > { %378 = vst [vmem:[#allocation2 + $0x170] sm:$0xff] %v3125_v0  ;;  %379 = vst [vmem:[#allocation2 + $0x178] sm:$0xff] %v3125_v0 }
  0x6a   : > { %380 = vst [vmem:[#allocation2 + $0x68] sm:$0xff] %v3125_v0  ;;  %381 = vst [vmem:[#allocation2 + $0x190] sm:$0xff] %v3125_v0  ;;  %394 = sbr.rel (!%p390_p2) target bundleno = 112 (0x70), region = 52 }
  0x6b   : > { %382 = vst [vmem:[#allocation2 + $0x198] sm:$0xff] %v3125_v0  ;;  %383 = vst [vmem:[#allocation2 + $0x38] sm:$0xff] %v3125_v0 }
  0x6c   : > { %384 = vst [vmem:[#allocation2 + $0xc0] sm:$0xff] %v3125_v0  ;;  %385 = vst [vmem:[#allocation2 + $0x1c0] sm:$0xff] %v3125_v0 }
  0x6d   : > { %386 = vst [vmem:[#allocation2 + $0x158] sm:$0xff] %v3125_v0  ;;  %387 = vst [vmem:[#allocation2 + $0x10] sm:$0xff] %v3125_v0 }
  0x6e   : > { %388 = vst [vmem:[#allocation2 + $0x58] sm:$0xff] %v3125_v0  ;;  %389 = vst [vmem:[#allocation2 + $0xa0] sm:$0xff] %v3125_v0 }
  0x6f   : > { %395 = vst [vmem:[#allocation10] sm:$0x1] %v3126_v1  ;;  %396 = vst [vmem:[#allocation12] sm:$0x1] %v3126_v1 }
  0x70 PF: > { %v2861_v2 = vld [vmem:[#allocation6 + $0x38] sm:$0xff]   ;;  %v2862_v3 = vld [vmem:[#allocation6 + $0x30] sm:$0xff]   ;;  %v2863_v4 = vld [vmem:[#allocation6 + $0x28] sm:$0xff]   ;;  %s2430_s26 = sshll.u32 %s3110_s21, 12  ;;  %s2071_s28 = sshll.u32 %s3372_s1, 4  ;;  %s3841_s28 = int_to_ptr.vmem [resolvable:$true] %s2071_s28 }
  0x71   : > { %2662 = vmatprep.subr.bf16.mxu0 %v2861_v2  ;;  %2742 = vmatprep.subr.bf16.mxu1 %v2861_v2  ;;  %v2864_v5 = vld [vmem:[#allocation6 + $0x20] sm:$0xff]   ;;  %v2865_v7 = vld [vmem:[#allocation6 + $0x18] sm:$0xff]   ;;  %v2866_v8 = vld [vmem:[#allocation6 + $0x10] sm:$0xff]   ;;  %s3838_s12 = scalar_lea.hbm %s3950_s3, %s2430_s26  ;;  %s2057_s13 = scalar_lea.sflag [#allocation5], %s3289_s11 }
  0x72   : > { %2663 = vmatpush3.bf16.msra.mxu0 %v2861_v2  ;;  %2750 = vmatpush3.bf16.msra.mxu1 %v2861_v2  ;;  %v2869_v6 = vld [vmem:[%s3295_s25] sm:$0xff]   ;;  %v2867_v9 = vld [vmem:[#allocation6 + $0x8] sm:$0xff]   ;;  %v2871_v13 = vld [vmem:[%s3295_s25 + $0x10] sm:$0xff]   ;;  %s2982_s24 = scalar_lea.vmem %s3841_s28, 4096  ;;  %s3127_s9 = smov [#allocation9]  }
  0x73   : > { %2664 = vmatprep.subr.bf16.mxu0 %v2862_v3  ;;  %2743 = vmatprep.subr.bf16.mxu1 %v2862_v3  ;;  %v2884_v10 = vld [vmem:[%s3295_s25 + $0x80] sm:$0xff]   ;;  %v2870_v12 = vld [vmem:[%s3295_s25 + $0x8] sm:$0xff]   ;;  %v2887_v15 = vld [vmem:[%s3295_s25 + $0x90] sm:$0xff]   ;;  %p2983_p1 = scmp.ne.s32.totalorder %s3841_s28, %s2982_s24  ;;  %s2986_s7 = sshll.u32 %s3127_s9, 4  ;;  %s2987_s7 = int_to_ptr.vmem [resolvable:$false] %s2986_s7 }
  0x74   : > { %2678 = vmatprep.mubr.bf16.mxu0 %v2869_v6  ;;  %v2868_v11 = vld [vmem:[#allocation6] sm:$0xff]   ;;  %2710 = vmatprep.mubr.bf16.mxu1 %v2884_v10  ;;  %v2886_v14 = vld [vmem:[%s3295_s25 + $0x88] sm:$0xff]   ;;  %v2872_v16 = vld [vmem:[%s3295_s25 + $0x18] sm:$0xff]   ;;  %s2988_s14 = scalar_lea.vmem %s2987_s7, 8192  ;;  %p2989_p8 = scmp.lt.s32.totalorder %s3841_s28, %s2987_s7 }
  0x75   : > { %v2873_v17 = vld [vmem:[%s3295_s25 + $0x20] sm:$0xff]   ;;  %v2888_v18 = vld [vmem:[%s3295_s25 + $0x98] sm:$0xff]   ;;  %v2874_v20 = vld [vmem:[%s3295_s25 + $0x28] sm:$0xff]   ;;  %p2984_p4 = pnand %p2983_p1, %p3259_p5  ;;  %p2990_p0 = scmp.lt.s32.totalorder %s2988_s14, %s2982_s24 }
  0x76   : > { %2665 = vmatpush3.bf16.msra.mxu0 %v2862_v3  ;;  %2751 = vmatpush3.bf16.msra.mxu1 %v2862_v3  ;;  %v2889_v19 = vld [vmem:[%s3295_s25 + $0xa0] sm:$0xff]   ;;  %v2890_v21 = vld [vmem:[%s3295_s25 + $0xa8] sm:$0xff]   ;;  %v2875_v22 = vld [vmem:[%s3295_s25 + $0x30] sm:$0xff]  }
  0x77   : > { %2666 = vmatprep.subr.bf16.mxu0 %v2863_v4  ;;  %2744 = vmatprep.subr.bf16.mxu1 %v2863_v4  ;;  %v2891_v23 = vld [vmem:[%s3295_s25 + $0xb0] sm:$0xff]   ;;  %v2876_v24 = vld [vmem:[%s3295_s25 + $0x38] sm:$0xff]   ;;  %v2877_v26 = vld [vmem:[%s3295_s25 + $0x40] sm:$0xff]   ;;  %p2985_p6 = pneg %p2984_p4  ;;  %p2991_p10 = por %p2990_p0, %p2989_p8 }
  0x78   : > { %v2892_v25 = vld [vmem:[%s3295_s25 + $0xb8] sm:$0xff]   ;;  %v2893_v27 = vld [vmem:[%s3295_s25 + $0xc0] sm:$0xff]   ;;  %v2878_v28 = vld [vmem:[%s3295_s25 + $0x48] sm:$0xff]  }
  0x79   : > { %v2894_v29 = vld [vmem:[%s3295_s25 + $0xc8] sm:$0xff]   ;;  %v2879_v30 = vld [vmem:[%s3295_s25 + $0x50] sm:$0xff]   ;;  %v2880_v32 = vld [vmem:[%s3295_s25 + $0x58] sm:$0xff]   ;;  %p2992_p9 = pnand %p2991_p10, %p2985_p6 }
  0x7a   : > { %2667 = vmatpush3.bf16.msra.mxu0 %v2863_v4  ;;  %2752 = vmatpush3.bf16.msra.mxu1 %v2863_v4  ;;  %v2895_v31 = vld [vmem:[%s3295_s25 + $0xd0] sm:$0xff]   ;;  %v2896_v33 = vld [vmem:[%s3295_s25 + $0xd8] sm:$0xff]   ;;  %v2881_v34 = vld [vmem:[%s3295_s25 + $0x60] sm:$0xff]  }
  0x7b   : > { %2668 = vmatprep.subr.bf16.mxu0 %v2864_v5  ;;  %2745 = vmatprep.subr.bf16.mxu1 %v2864_v5  ;;  %v2897_v35 = vld [vmem:[%s3295_s25 + $0xe0] sm:$0xff]   ;;  %v2882_v36 = vld [vmem:[%s3295_s25 + $0x68] sm:$0xff]   ;;  %v2883_v38 = vld [vmem:[%s3295_s25 + $0x70] sm:$0xff]  }
  0x7c   : > { %v2898_v37 = vld [vmem:[%s3295_s25 + $0xe8] sm:$0xff]   ;;  %v2899_v39 = vld [vmem:[%s3295_s25 + $0xf0] sm:$0xff]   ;;  %v2885_v40 = vld [vmem:[%s3295_s25 + $0x78] sm:$0xff]  }
  0x7d   : > { %v2900_v41 = vld [vmem:[%s3295_s25 + $0xf8] sm:$0xff]   ;;  %v431_v43 = vld [vmem:[#allocation2 + $0x100] sm:$0xff]  ;;  %v397_v46 = vld [vmem:[#allocation2 + $0xb0] sm:$0xff] }
  0x7e   : > { %2669 = vmatpush3.bf16.msra.mxu0 %v2864_v5  ;;  %2753 = vmatpush3.bf16.msra.mxu1 %v2864_v5  ;;  %v399_v42 = vld [vmem:[#allocation2 + $0xd8] sm:$0xff]  ;;  %v3408_v45 = vld [vmem:[#allocation8] ss:$0 sm:$0xff]  ;;  %v429_v50 = vld [vmem:[#allocation2 + $0x148] sm:$0xff] }
  0x7f   : > { %2670 = vmatprep.subr.bf16.mxu0 %v2865_v7  ;;  %2746 = vmatprep.subr.bf16.mxu1 %v2865_v7  ;;  %v400_v55 = vld [vmem:[#allocation2 + $0x18] sm:$0xff]  ;;  %v398_v57 = vld [vmem:[#allocation2 + $0x1b0] sm:$0xff] }
  0x80   : > { %v403_v6 = vld [vmem:[#allocation2 + $0x130] sm:$0xff] }
  0x82   : > { %2671 = vmatpush3.bf16.msra.mxu0 %v2865_v7  ;;  %2754 = vmatpush3.bf16.msra.mxu1 %v2865_v7 }
  0x83   : > { %2672 = vmatprep.subr.bf16.mxu0 %v2866_v8  ;;  %2747 = vmatprep.subr.bf16.mxu1 %v2866_v8 }
  0x86   : > { %2673 = vmatpush3.bf16.msra.mxu0 %v2866_v8  ;;  %2755 = vmatpush3.bf16.msra.mxu1 %v2866_v8 }
  0x87   : > { %2674 = vmatprep.subr.bf16.mxu0 %v2867_v9  ;;  %2748 = vmatprep.subr.bf16.mxu1 %v2867_v9 }
  0x8a   : > { %2675 = vmatpush3.bf16.msra.mxu0 %v2867_v9  ;;  %2756 = vmatpush3.bf16.msra.mxu1 %v2867_v9 }
  0x8b   : > { %2676 = vmatprep.subr.bf16.mxu0 %v2868_v11  ;;  %2749 = vmatprep.subr.bf16.mxu1 %v2868_v11 }
  0x8e   : > { %2677 = vmatpush3.bf16.msra.mxu0 %v2868_v11  ;;  %2757 = vmatpush3.bf16.msra.mxu1 %v2868_v11 }
  0x91   : > { %2679 = vmatmul.mubr.bf16.vlgmr.msra.gmra.mxu0 %v2870_v12  ;;  %2711 = vmatmul.mubr.bf16.vlgmr.msra.gmra.mxu1 %v2886_v14 }
  0x92   : > { %2682 = vmatprep.mubr.bf16.mxu0 %v2871_v13  ;;  %2714 = vmatprep.mubr.bf16.mxu1 %v2887_v15 }
  0x99   : > { %2683 = vmatmul.mubr.bf16.gmra.mxu0 %v2872_v16  ;;  %2715 = vmatmul.mubr.bf16.gmra.mxu1 %v2888_v18  ;;  %v401_v18 = vld [vmem:[#allocation2 + $0x50] sm:$0xff] }
  0x9a   : > { %2686 = vmatprep.mubr.bf16.mxu0 %v2873_v17  ;;  %2718 = vmatprep.mubr.bf16.mxu1 %v2889_v19 }
  0xa1   : > { %2687 = vmatmul.mubr.bf16.gmra.mxu0 %v2874_v20  ;;  %2719 = vmatmul.mubr.bf16.gmra.mxu1 %v2890_v21 }
  0xa2   : > { %2690 = vmatprep.mubr.bf16.mxu0 %v2875_v22  ;;  %2722 = vmatprep.mubr.bf16.mxu1 %v2891_v23 }
  0xa9   : > { %2691 = vmatmul.mubr.bf16.gmra.mxu0 %v2876_v24  ;;  %2723 = vmatmul.mubr.bf16.gmra.mxu1 %v2892_v25 }
  0xaa   : > { %2694 = vmatprep.mubr.bf16.mxu0 %v2877_v26  ;;  %2726 = vmatprep.mubr.bf16.mxu1 %v2893_v27 }
  0xb1   : > { %2695 = vmatmul.mubr.bf16.gmra.mxu0 %v2878_v28  ;;  %2727 = vmatmul.mubr.bf16.gmra.mxu1 %v2894_v29 }
  0xb2   : > { %2698 = vmatprep.mubr.bf16.mxu0 %v2879_v30  ;;  %2730 = vmatprep.mubr.bf16.mxu1 %v2895_v31  ;;  %v404_v31 = vld [vmem:[#allocation2 + $0x48] sm:$0xff] }
  0xb9   : > { %2699 = vmatmul.mubr.bf16.gmra.mxu0 %v2880_v32  ;;  %2731 = vmatmul.mubr.bf16.gmra.mxu1 %v2896_v33 }
  0xba   : > { %2702 = vmatprep.mubr.bf16.mxu0 %v2881_v34  ;;  %2734 = vmatprep.mubr.bf16.mxu1 %v2897_v35 }
  0xc1   : > { %2703 = vmatmul.mubr.bf16.gmra.mxu0 %v2882_v36  ;;  %2735 = vmatmul.mubr.bf16.gmra.mxu1 %v2898_v37 }
  0xc2   : > { %2706 = vmatprep.mubr.bf16.mxu0 %v2883_v38  ;;  %2738 = vmatprep.mubr.bf16.mxu1 %v2899_v39  ;;  %v402_v38 = vld [vmem:[#allocation2 + $0x168] sm:$0xff] }
  0xc3   : > { %v432_v39 = vld [vmem:[#allocation2 + $0xc8] sm:$0xff] }
  0xc9   : > { %2707 = vmatmul.mubr.bf16.gmra.mxu0 %v2885_v40  ;;  %2739 = vmatmul.mubr.bf16.gmra.mxu1 %v2900_v41 }
 0x151   : > { %v2680_v44 = vpop.f32.mrf.mxu0  ;;  %v2712_v47 = vpop.f32.mrf.mxu1 }
 0x152   : > { %v1072_v48 = vadd.f32 %v2680_v44, %v399_v42  ;;  %v3410_v49 = vadd.f32 %v2712_v47, %v431_v43 }
 0x153   : > { %v815_v51 = vpop.f32.mrf.mxu0  ;;  %v943_v52 = vpop.f32.mrf.mxu1 }
 0x154   : > { %1136 = vst [vmem:[#allocation2 + $0xd8] sm:$0xff] %v1072_v48  ;;  %v1482_v53 = vadd.f32 %v3408_v45, %v1072_v48  ;;  %v1070_v54 = vadd.f32 %v815_v51, %v397_v46  ;;  %1168 = vst [vmem:[#allocation2 + $0x100] sm:$0xff] %v3410_v49  ;;  %v3416_v58 = vadd.f32 %v3408_v45, %v3410_v49  ;;  %v407_v51 = vld [vmem:[#allocation2 + $0x118] sm:$0xff] }
 0x155   : > { %v2681_v56 = vpop.f32.mrf.mxu0  ;;  %v3418_v59 = vadd.f32 %v943_v52, %v429_v50  ;;  %v3420_v60 = vpop.f32.mrf.mxu1  ;;  %v1340_v63 = vmul.f32 %v1072_v48, %v1072_v48  ;;  %v3425_v3 = vmul.f32 %v3410_v49, %v3410_v49 }
 0x156   : > { %vm1546_vm0 = vcmp.ge.f32.partialorder %v1482_v53, 0.0  ;;  %v1610_v61 = vmul.f32 0.2, %v1482_v53  ;;  %1134 = vst [vmem:[#allocation2 + $0xb0] sm:$0xff] %v1070_v54  ;;  %v1480_v62 = vadd.f32 %v3408_v45, %v1070_v54  ;;  %v1338_v0 = vmul.f32 %v1070_v54, %v1070_v54 }
 0x157   : > { %v1073_v1 = vadd.f32 %v2681_v56, %v400_v55  ;;  %v818_v2 = vpop.f32.mrf.mxu0  ;;  %1166 = vst [vmem:[#allocation2 + $0x148] sm:$0xff] %v3418_v59  ;;  %v3428_v4 = vpop.f32.mrf.mxu1  ;;  %vm1578_vm1 = vcmp.ge.f32.partialorder %v3416_v58, 0.0  ;;  %v1642_v7 = vmul.f32 0.2, %v3416_v58  ;;  %v3434_v8 = vmul.f32 %v3418_v59, %v3418_v59 }
 0x158   : > { %v1071_v5 = vadd.f32 %v818_v2, %v398_v57  ;;  %v1674_v9 = vsel %vm1546_vm0, %v1482_v53, %v1610_v61  ;;  %vm1544_vm2 = vcmp.ge.f32.partialorder %v1480_v62, 0.0  ;;  %v1608_v10 = vmul.f32 0.2, %v1480_v62  ;;  %v405_v53 = vld [vmem:[#allocation2 + $0x180] sm:$0xff] }
 0x159   : > { %1137 = vst [vmem:[#allocation2 + $0x18] sm:$0xff] %v1073_v1  ;;  %v1483_v11 = vadd.f32 %v3408_v45, %v1073_v1  ;;  %v2684_v12 = vpop.f32.mrf.mxu0  ;;  %v3438_v13 = vpop.f32.mrf.mxu1  ;;  %v1341_v14 = vmul.f32 %v1073_v1, %v1073_v1  ;;  %v3443_v22 = vadd.f32 %v3408_v45, %v3418_v59  ;;  %v3461_v55 = vadd.f32 %v3420_v60, %v432_v39 }
 0x15a   : > { %1135 = vst [vmem:[#allocation2 + $0x1b0] sm:$0xff] %v1071_v5  ;;  %v1266_v15 = vadd.f32 %v1071_v5, %v1070_v54  ;;  %v1339_v16 = vmul.f32 %v1071_v5, %v1071_v5  ;;  %v1481_v17 = vadd.f32 %v3408_v45, %v1071_v5  ;;  %v1076_v20 = vadd.f32 %v2684_v12, %v403_v6 }
 0x15b   : > { %vm1547_vm3 = vcmp.ge.f32.partialorder %v1483_v11, 0.0  ;;  %v1611_v19 = vmul.f32 0.2, %v1483_v11  ;;  %v831_v21 = vpop.f32.mrf.mxu0  ;;  %v3445_v23 = vpop.f32.mrf.mxu1  ;;  %v1672_v27 = vsel %vm1544_vm2, %v1480_v62, %v1608_v10  ;;  %v3457_v54 = vsel %vm1578_vm1, %v3416_v58, %v1642_v7  ;;  %1169 = vst [vmem:[#allocation2 + $0xc8] sm:$0xff] %v3461_v55 }
 0x15c   : > { %v1267_v24 = vadd.f32 %v1266_v15, %v1072_v48  ;;  %v1402_v25 = vadd.f32 %v1339_v16, %v1338_v0  ;;  %vm1545_vm4 = vcmp.ge.f32.partialorder %v1481_v17, 0.0  ;;  %v1609_v26 = vmul.f32 0.2, %v1481_v17  ;;  %1140 = vst [vmem:[#allocation2 + $0x130] sm:$0xff] %v1076_v20 }
 0x15d   : > { %v1675_v28 = vsel %vm1547_vm3, %v1483_v11, %v1611_v19  ;;  %v1486_v29 = vadd.f32 %v3408_v45, %v1076_v20  ;;  %v1074_v30 = vadd.f32 %v831_v21, %v401_v18  ;;  %v2685_v32 = vpop.f32.mrf.mxu0  ;;  %v3449_v33 = vpop.f32.mrf.mxu1  ;;  %vm1576_vm6 = vcmp.ge.f32.partialorder %v3443_v22, 0.0 }
 0x15e   : > { %v2439_v34 = vpack.c.bf16 %v1675_v28, %v1674_v9  ;;  %v1403_v35 = vadd.f32 %v1402_v25, %v1340_v63  ;;  %v1673_v36 = vsel %vm1545_vm4, %v1481_v17, %v1609_v26  ;;  %v1268_v37 = vadd.f32 %v1267_v24, %v1073_v1  ;;  %v408_v25 = vld [vmem:[#allocation2 + $0x98] sm:$0xff]  ;;  %v406_v26 = vld [vmem:[#allocation2 + $0x110] sm:$0xff] }
 0x15f   : > { %v2434_v40 = vpack.c.bf16 %v1673_v36, %v1672_v27  ;;  %vm1550_vm5 = vcmp.ge.f32.partialorder %v1486_v29, 0.0  ;;  %v1614_v41 = vmul.f32 0.2, %v1486_v29  ;;  %1138 = vst [vmem:[#allocation2 + $0x50] sm:$0xff] %v1074_v30  ;;  %v1342_v42 = vmul.f32 %v1074_v30, %v1074_v30  ;;  %v834_v43 = vpop.f32.mrf.mxu0  ;;  %v3463_v56 = vpop.f32.mrf.mxu1  ;;  %v411_v27 = vld [vmem:[#allocation2 + $0x108] sm:$0xff] }
 0x160   : > { %2591 = vst [vmem:[%s3372_s1 + $0x8] sm:$0xff] %v2439_v34   ;;  %v1269_v44 = vadd.f32 %v1268_v37, %v1074_v30  ;;  %v1404_v46 = vadd.f32 %v1403_v35, %v1341_v14  ;;  %v1484_v47 = vadd.f32 %v3408_v45, %v1074_v30  ;;  %v1077_v48 = vadd.f32 %v2685_v32, %v404_v31 }
 0x161   : > { %2435 = vst [vmem:[%s3372_s1] sm:$0xff] %v2434_v40   ;;  %v1075_v50 = vadd.f32 %v834_v43, %v402_v38  ;;  %v2688_v52 = vpop.f32.mrf.mxu0  ;;  %v1344_v57 = vmul.f32 %v1076_v20, %v1076_v20  ;;  %v1678_v61 = vsel %vm1550_vm5, %v1486_v29, %v1614_v41  ;;  %v1640_v7 = vmul.f32 0.2, %v3443_v22  ;;  %v3470_v14 = vpop.f32.mrf.mxu1 }
 0x162   : > { %v1405_v62 = vadd.f32 %v1404_v46, %v1342_v42  ;;  %v1612_v63 = vmul.f32 0.2, %v1484_v47  ;;  %1141 = vst [vmem:[#allocation2 + $0x48] sm:$0xff] %v1077_v48  ;;  %v1487_v0 = vadd.f32 %v3408_v45, %v1077_v48  ;;  %vm1548_vm7 = vcmp.ge.f32.partialorder %v1484_v47, 0.0 }
 0x163   : > { %1139 = vst [vmem:[#allocation2 + $0x168] sm:$0xff] %v1075_v50  ;;  %v1270_v1 = vadd.f32 %v1269_v44, %v1075_v50  ;;  %v1343_v2 = vmul.f32 %v1075_v50, %v1075_v50  ;;  %v1485_v58 = vadd.f32 %v3408_v45, %v1075_v50  ;;  %v847_v5 = vpop.f32.mrf.mxu0  ;;  %v1080_v60 = vadd.f32 %v2688_v52, %v407_v51  ;;  %v3475_v38 = vpop.f32.mrf.mxu1 }
 0x164   : > { %v1078_v6 = vadd.f32 %v847_v5, %v405_v53  ;;  %vm1551_vm8 = vcmp.ge.f32.partialorder %v1487_v0, 0.0  ;;  %v1615_v9 = vmul.f32 0.2, %v1487_v0  ;;  %v1345_v15 = vmul.f32 %v1077_v48, %v1077_v48 }
 0x165   : > { %v1271_v10 = vadd.f32 %v1270_v1, %v1076_v20  ;;  %v1406_v11 = vadd.f32 %v1405_v62, %v1343_v2  ;;  %v2689_v12 = vpop.f32.mrf.mxu0  ;;  %vm1549_vm9 = vcmp.ge.f32.partialorder %v1485_v58, 0.0  ;;  %v1613_v16 = vmul.f32 0.2, %v1485_v58  ;;  %1144 = vst [vmem:[#allocation2 + $0x118] sm:$0xff] %v1080_v60  ;;  %v409_v62 = vld [vmem:[#allocation2 + $0x120] sm:$0xff] }
 0x166   : > { %v1490_v17 = vadd.f32 %v3408_v45, %v1080_v60  ;;  %1142 = vst [vmem:[#allocation2 + $0x180] sm:$0xff] %v1078_v6  ;;  %v1676_v18 = vsel %vm1548_vm7, %v1484_v47, %v1612_v63  ;;  %v1679_v19 = vsel %vm1551_vm8, %v1487_v0, %v1615_v9  ;;  %v1346_v31 = vmul.f32 %v1078_v6, %v1078_v6  ;;  %v3492_v63 = vpop.f32.mrf.mxu1 }
 0x167   : > { %v1407_v21 = vadd.f32 %v1406_v11, %v1344_v57  ;;  %v1272_v24 = vadd.f32 %v1271_v10, %v1077_v48  ;;  %v850_v20 = vpop.f32.mrf.mxu0  ;;  %v2449_v28 = vpack.c.bf16 %v1679_v19, %v1678_v61  ;;  %v1677_v29 = vsel %vm1549_vm9, %v1485_v58, %v1613_v16  ;;  %v412_v58 = vld [vmem:[#allocation2 + $0x60] sm:$0xff]  ;;  %v410_v16 = vld [vmem:[#allocation2 + $0x150] sm:$0xff] }
 0x168   : > { %v1618_v30 = vmul.f32 0.2, %v1490_v17  ;;  %v2444_v32 = vpack.c.bf16 %v1677_v29, %v1676_v18  ;;  %v1488_v36 = vadd.f32 %v3408_v45, %v1078_v6  ;;  %vm1554_vm10 = vcmp.ge.f32.partialorder %v1490_v17, 0.0 }
 0x169   : > { %v1273_v34 = vadd.f32 %v1272_v24, %v1078_v6  ;;  %v1408_v35 = vadd.f32 %v1407_v21, %v1345_v15  ;;  %v2692_v37 = vpop.f32.mrf.mxu0  ;;  %2593 = vst [vmem:[%s3372_s1 + $0x18] sm:$0xff] %v2449_v28   ;;  %v1081_v39 = vadd.f32 %v2689_v12, %v408_v25  ;;  %v1079_v40 = vadd.f32 %v850_v20, %v406_v26  ;;  %v415_v21 = vld [vmem:[#allocation2 + $0x138] sm:$0xff]  ;;  %v413_v24 = vld [vmem:[#allocation2 + $0xe0] sm:$0xff]  ;;  %v3495_v25 = vpop.f32.mrf.mxu1 }
 0x16a   : > { %v3478_v41 = vadd.f32 %v2692_v37, %v411_v27  ;;  %2592 = vst [vmem:[%s3372_s1 + $0x10] sm:$0xff] %v2444_v32   ;;  %v1348_v42 = vmul.f32 %v1080_v60, %v1080_v60  ;;  %v1616_v44 = vmul.f32 0.2, %v1488_v36  ;;  %v3484_v47 = vsel %vm1576_vm6, %v3443_v22, %v1640_v7 }
 0x16b   : > { %v1409_v43 = vadd.f32 %v1408_v35, %v1346_v31  ;;  %v863_v46 = vpop.f32.mrf.mxu0  ;;  %vm1552_vm11 = vcmp.ge.f32.partialorder %v1488_v36, 0.0  ;;  %1145 = vst [vmem:[#allocation2 + $0x98] sm:$0xff] %v1081_v39  ;;  %v1491_v48 = vadd.f32 %v3408_v45, %v1081_v39  ;;  %1143 = vst [vmem:[#allocation2 + $0x110] sm:$0xff] %v1079_v40  ;;  %v1274_v50 = vadd.f32 %v1273_v34, %v1079_v40 }
 0x16c   : > { %v1347_v51 = vmul.f32 %v1079_v40, %v1079_v40  ;;  %1148 = vst [vmem:[#allocation2 + $0x108] sm:$0xff] %v3478_v41  ;;  %v1682_v52 = vsel %vm1554_vm10, %v1490_v17, %v1618_v30  ;;  %v1349_v53 = vmul.f32 %v1081_v39, %v1081_v39  ;;  %v1489_v57 = vadd.f32 %v3408_v45, %v1079_v40 }
 0x16d   : > { %v1494_v61 = vadd.f32 %v3408_v45, %v3478_v41  ;;  %v2693_v22 = vpop.f32.mrf.mxu0  ;;  %vm1555_vm12 = vcmp.ge.f32.partialorder %v1491_v48, 0.0  ;;  %v1619_v0 = vmul.f32 0.2, %v1491_v48  ;;  %v1275_v1 = vadd.f32 %v1274_v50, %v1080_v60 }
 0x16e   : > { %v1410_v2 = vadd.f32 %v1409_v43, %v1347_v51  ;;  %v1680_v5 = vsel %vm1552_vm11, %v1488_v36, %v1616_v44  ;;  %vm1553_vm13 = vcmp.ge.f32.partialorder %v1489_v57, 0.0  ;;  %v1617_v6 = vmul.f32 0.2, %v1489_v57  ;;  %v3506_v44 = vpop.f32.mrf.mxu1 }
 0x16f   : > { %v1622_v7 = vmul.f32 0.2, %v1494_v61  ;;  %v866_v9 = vpop.f32.mrf.mxu0  ;;  %v1683_v10 = vsel %vm1555_vm12, %v1491_v48, %v1619_v0  ;;  %v1082_v12 = vadd.f32 %v863_v46, %v409_v62  ;;  %v1276_v15 = vadd.f32 %v1275_v1, %v1081_v39  ;;  %v416_v62 = vld [vmem:[#allocation2 + $0x140] sm:$0xff] }
 0x170   : > { %v1411_v11 = vadd.f32 %v1410_v2, %v1348_v42  ;;  %v2459_v17 = vpack.c.bf16 %v1683_v10, %v1682_v52  ;;  %v1681_v18 = vsel %vm1553_vm13, %v1489_v57, %v1617_v6  ;;  %vm1558_vm14 = vcmp.ge.f32.partialorder %v1494_v61, 0.0  ;;  %v3518_v10 = vpop.f32.mrf.mxu1 }
 0x171   : > { %v1085_v19 = vadd.f32 %v2693_v22, %v412_v58  ;;  %v2696_v60 = vpop.f32.mrf.mxu0  ;;  %v2454_v26 = vpack.c.bf16 %v1681_v18, %v1680_v5  ;;  %1146 = vst [vmem:[#allocation2 + $0x120] sm:$0xff] %v1082_v12  ;;  %v1277_v20 = vadd.f32 %v1276_v15, %v1082_v12  ;;  %v1350_v27 = vmul.f32 %v1082_v12, %v1082_v12  ;;  %v414_v22 = vld [vmem:[#allocation2 + $0x188] sm:$0xff] }
 0x172   : > { %v1412_v28 = vadd.f32 %v1411_v11, %v1349_v53  ;;  %2595 = vst [vmem:[%s3372_s1 + $0x28] sm:$0xff] %v2459_v17   ;;  %v1352_v29 = vmul.f32 %v3478_v41, %v3478_v41  ;;  %v1492_v30 = vadd.f32 %v3408_v45, %v1082_v12  ;;  %v1083_v32 = vadd.f32 %v866_v9, %v410_v16 }
 0x173   : > { %1149 = vst [vmem:[#allocation2 + $0x60] sm:$0xff] %v1085_v19  ;;  %v1495_v31 = vadd.f32 %v3408_v45, %v1085_v19  ;;  %v879_v34 = vpop.f32.mrf.mxu0  ;;  %2594 = vst [vmem:[%s3372_s1 + $0x20] sm:$0xff] %v2454_v26   ;;  %v1686_v35 = vsel %vm1558_vm14, %v1494_v61, %v1622_v7  ;;  %v3504_v37 = vadd.f32 %v2696_v60, %v415_v21  ;;  %v417_v60 = vld [vmem:[#allocation2 + $0x80] sm:$0xff] }
 0x174   : > { %v1413_v36 = vadd.f32 %v1412_v28, %v1350_v27  ;;  %v1086_v39 = vadd.f32 %v879_v34, %v413_v24  ;;  %vm1556_vm15 = vcmp.ge.f32.partialorder %v1492_v30, 0.0  ;;  %v1620_v40 = vmul.f32 0.2, %v1492_v30  ;;  %1147 = vst [vmem:[#allocation2 + $0x150] sm:$0xff] %v1083_v32  ;;  %v3523_v34 = vpop.f32.mrf.mxu1 }
 0x175   : > { %vm1559_vm0 = vcmp.ge.f32.partialorder %v1495_v31, 0.0  ;;  %v1623_v42 = vmul.f32 0.2, %v1495_v31  ;;  %v2697_v43 = vpop.f32.mrf.mxu0  ;;  %v1353_v46 = vmul.f32 %v1085_v19, %v1085_v19  ;;  %v1278_v48 = vadd.f32 %v1277_v20, %v1083_v32  ;;  %1152 = vst [vmem:[#allocation2 + $0x138] sm:$0xff] %v3504_v37 }
 0x176   : > { %v1351_v50 = vmul.f32 %v1083_v32, %v1083_v32  ;;  %v1493_v51 = vadd.f32 %v3408_v45, %v1083_v32  ;;  %1150 = vst [vmem:[#allocation2 + $0xe0] sm:$0xff] %v1086_v39  ;;  %v1684_v52 = vsel %vm1556_vm15, %v1492_v30, %v1620_v40  ;;  %v3512_v57 = vmul.f32 %v3504_v37, %v3504_v37 }
 0x177   : > { %v1687_v53 = vsel %vm1559_vm0, %v1495_v31, %v1623_v42  ;;  %v1498_v61 = vadd.f32 %v3408_v45, %v3504_v37  ;;  %v882_v0 = vpop.f32.mrf.mxu0  ;;  %v1279_v2 = vadd.f32 %v1278_v48, %v3478_v41  ;;  %v1496_v7 = vadd.f32 %v3408_v45, %v1086_v39  ;;  %v419_v41 = vld [vmem:[#allocation2 + $0x1b8] sm:$0xff] }
 0x178   : > { %v2469_v1 = vpack.c.bf16 %v1687_v53, %v1686_v35  ;;  %v1414_v58 = vadd.f32 %v1413_v36, %v1351_v50  ;;  %vm1557_vm1 = vcmp.ge.f32.partialorder %v1493_v51, 0.0  ;;  %v1621_v5 = vmul.f32 0.2, %v1493_v51 }
 0x179   : > { %vm1562_vm2 = vcmp.ge.f32.partialorder %v1498_v61, 0.0  ;;  %v1626_v6 = vmul.f32 0.2, %v1498_v61  ;;  %v2700_v9 = vpop.f32.mrf.mxu0  ;;  %v1280_v12 = vadd.f32 %v1279_v2, %v1085_v19  ;;  %v1089_v15 = vadd.f32 %v2697_v43, %v416_v62  ;;  %v423_v2 = vld [vmem:[#allocation2 + $0x160] sm:$0xff] }
 0x17a   : > { %2597 = vst [vmem:[%s3372_s1 + $0x38] sm:$0xff] %v2469_v1   ;;  %v1415_v11 = vadd.f32 %v1414_v58, %v1352_v29  ;;  %v1087_v16 = vadd.f32 %v882_v0, %v414_v22  ;;  %v1685_v17 = vsel %vm1557_vm1, %v1493_v51, %v1621_v5  ;;  %v1354_v21 = vmul.f32 %v1086_v39, %v1086_v39  ;;  %v420_v0 = vld [vmem:[#allocation2 + $0x28] sm:$0xff]  ;;  %v3530_v5 = vpop.f32.mrf.mxu1 }
 0x17b   : > { %v1690_v18 = vsel %vm1562_vm2, %v1498_v61, %v1626_v6  ;;  %vm1560_vm3 = vcmp.ge.f32.partialorder %v1496_v7, 0.0  ;;  %v895_v24 = vpop.f32.mrf.mxu0  ;;  %v2464_v26 = vpack.c.bf16 %v1685_v17, %v1684_v52  ;;  %v1281_v20 = vadd.f32 %v1280_v12, %v1086_v39  ;;  %1153 = vst [vmem:[#allocation2 + $0x140] sm:$0xff] %v1089_v15  ;;  %v418_v1 = vld [vmem:[#allocation2 + $0x1a8] sm:$0xff] }
 0x17c   : > { %v1416_v27 = vadd.f32 %v1415_v11, %v1353_v46  ;;  %v1624_v28 = vmul.f32 0.2, %v1496_v7  ;;  %1151 = vst [vmem:[#allocation2 + $0x188] sm:$0xff] %v1087_v16  ;;  %v1357_v30 = vmul.f32 %v1089_v15, %v1089_v15  ;;  %v1499_v29 = vadd.f32 %v3408_v45, %v1089_v15 }
 0x17d   : > { %v1355_v19 = vmul.f32 %v1087_v16, %v1087_v16  ;;  %v1497_v31 = vadd.f32 %v3408_v45, %v1087_v16  ;;  %v2701_v32 = vpop.f32.mrf.mxu0  ;;  %2596 = vst [vmem:[%s3372_s1 + $0x30] sm:$0xff] %v2464_v26   ;;  %v1282_v36 = vadd.f32 %v1281_v20, %v1087_v16  ;;  %v1092_v40 = vadd.f32 %v2700_v9, %v419_v41  ;;  %v421_v9 = vld [vmem:[#allocation2 + $0x1e8] sm:$0xff] }
 0x17e   : > { %v1417_v35 = vadd.f32 %v1416_v27, %v1354_v21  ;;  %v1090_v42 = vadd.f32 %v895_v24, %v417_v60  ;;  %vm1563_vm4 = vcmp.ge.f32.partialorder %v1499_v29, 0.0  ;;  %v1627_v39 = vmul.f32 0.2, %v1499_v29 }
 0x17f   : > { %vm1561_vm5 = vcmp.ge.f32.partialorder %v1497_v31, 0.0  ;;  %v1625_v43 = vmul.f32 0.2, %v1497_v31  ;;  %v898_v46 = vpop.f32.mrf.mxu0  ;;  %v1688_v48 = vsel %vm1560_vm3, %v1496_v7, %v1624_v28  ;;  %v1283_v50 = vadd.f32 %v1282_v36, %v3504_v37  ;;  %1156 = vst [vmem:[#allocation2 + $0x1b8] sm:$0xff] %v1092_v40  ;;  %v3541_v28 = vpop.f32.mrf.mxu1 }
 0x180   : > { %v1418_v51 = vadd.f32 %v1417_v35, %v1355_v19  ;;  %v1502_v52 = vadd.f32 %v3408_v45, %v1092_v40  ;;  %1154 = vst [vmem:[#allocation2 + $0x80] sm:$0xff] %v1090_v42  ;;  %v1691_v53 = vsel %vm1563_vm4, %v1499_v29, %v1627_v39  ;;  %v1358_v62 = vmul.f32 %v1090_v42, %v1090_v42 }
 0x181   : > { %v1689_v61 = vsel %vm1561_vm5, %v1497_v31, %v1625_v43  ;;  %v1500_v22 = vadd.f32 %v3408_v45, %v1090_v42  ;;  %v2704_v58 = vpop.f32.mrf.mxu0  ;;  %v2479_v6 = vpack.c.bf16 %v1691_v53, %v1690_v18  ;;  %v1284_v12 = vadd.f32 %v1283_v50, %v1089_v15  ;;  %v3550_v53 = vpop.f32.mrf.mxu1 }
 0x182   : > { %v1419_v37 = vadd.f32 %v1418_v51, %v3512_v57  ;;  %v2474_v7 = vpack.c.bf16 %v1689_v61, %v1688_v48  ;;  %vm1566_vm6 = vcmp.ge.f32.partialorder %v1502_v52, 0.0  ;;  %v1630_v11 = vmul.f32 0.2, %v1502_v52  ;;  %v424_v48 = vld [vmem:[#allocation2 + $0x30] sm:$0xff] }
 0x183   : > { %vm1564_vm7 = vcmp.ge.f32.partialorder %v1500_v22, 0.0  ;;  %v1628_v16 = vmul.f32 0.2, %v1500_v22  ;;  %v911_v17 = vpop.f32.mrf.mxu0  ;;  %2599 = vst [vmem:[%s3372_s1 + $0x48] sm:$0xff] %v2479_v6   ;;  %v1093_v41 = vadd.f32 %v2701_v32, %v420_v0  ;;  %v1091_v60 = vadd.f32 %v898_v46, %v418_v1 }
 0x184   : > { %2598 = vst [vmem:[%s3372_s1 + $0x40] sm:$0xff] %v2474_v7   ;;  %v1420_v21 = vadd.f32 %v1419_v37, %v1357_v30  ;;  %v3535_v24 = vadd.f32 %v2704_v58, %v423_v2  ;;  %v1360_v26 = vmul.f32 %v1092_v40, %v1092_v40  ;;  %v1285_v20 = vadd.f32 %v1284_v12, %v1090_v42  ;;  %v422_v37 = vld [vmem:[#allocation2 + $0xf8] sm:$0xff]  ;;  %v427_v7 = vld [vmem:[#allocation2 + $0xf0] sm:$0xff] }
 0x185   : > { %v1094_v18 = vadd.f32 %v911_v17, %v421_v9  ;;  %v2705_v27 = vpop.f32.mrf.mxu0  ;;  %v3539_v57 = vmul.f32 %v3461_v55, %v3461_v55  ;;  %v1694_v15 = vsel %vm1566_vm6, %v1502_v52, %v1630_v11  ;;  %1157 = vst [vmem:[#allocation2 + $0x28] sm:$0xff] %v1093_v41  ;;  %v1503_v30 = vadd.f32 %v3408_v45, %v1093_v41  ;;  %v428_v17 = vld [vmem:[#allocation2 + $0x8] sm:$0xff] }
 0x186   : > { %v1421_v29 = vadd.f32 %v1420_v21, %v1358_v62  ;;  %1155 = vst [vmem:[#allocation2 + $0x1a8] sm:$0xff] %v1091_v60  ;;  %v1359_v19 = vmul.f32 %v1091_v60, %v1091_v60  ;;  %1160 = vst [vmem:[#allocation2 + $0x160] sm:$0xff] %v3535_v24  ;;  %v1692_v31 = vsel %vm1564_vm7, %v1500_v22, %v1628_v16 }
 0x187   : > { %v1286_v32 = vadd.f32 %v1285_v20, %v1091_v60  ;;  %v1501_v35 = vadd.f32 %v3408_v45, %v1091_v60  ;;  %v1506_v36 = vadd.f32 %v3408_v45, %v3535_v24  ;;  %1158 = vst [vmem:[#allocation2 + $0x1e8] sm:$0xff] %v1094_v18  ;;  %v914_v42 = vpop.f32.mrf.mxu0  ;;  %v1361_v39 = vmul.f32 %v1093_v41, %v1093_v41 }
 0x188   : > { %vm1567_vm8 = vcmp.ge.f32.partialorder %v1503_v30, 0.0  ;;  %v1631_v43 = vmul.f32 0.2, %v1503_v30  ;;  %v1422_v46 = vadd.f32 %v1421_v29, %v1359_v19  ;;  %v1504_v0 = vadd.f32 %v3408_v45, %v1094_v18 }
 0x189   : > { %v1287_v50 = vadd.f32 %v1286_v32, %v1092_v40  ;;  %vm1565_vm9 = vcmp.ge.f32.partialorder %v1501_v35, 0.0  ;;  %v1629_v51 = vmul.f32 0.2, %v1501_v35  ;;  %vm1570_vm10 = vcmp.ge.f32.partialorder %v1506_v36, 0.0  ;;  %v2708_v52 = vpop.f32.mrf.mxu0  ;;  %v425_v40 = vld [vmem:[#allocation2 + $0x1e0] sm:$0xff] }
 0x18a   : > { %v1695_v61 = vsel %vm1567_vm8, %v1503_v30, %v1631_v43  ;;  %v1423_v62 = vadd.f32 %v1422_v46, %v1360_v26  ;;  %v1634_v22 = vmul.f32 0.2, %v1506_v36  ;;  %v1097_v6 = vadd.f32 %v2705_v27, %v424_v48 }
 0x18b   : > { %v2489_v1 = vpack.c.bf16 %v1695_v61, %v1694_v15  ;;  %v1693_v2 = vsel %vm1565_vm9, %v1501_v35, %v1629_v51  ;;  %v1288_v58 = vadd.f32 %v1287_v50, %v1093_v41  ;;  %v927_v9 = vpop.f32.mrf.mxu0  ;;  %v1362_v12 = vmul.f32 %v1094_v18, %v1094_v18  ;;  %v3562_v15 = vpop.f32.mrf.mxu1 }
 0x18c   : > { %v2484_v11 = vpack.c.bf16 %v1693_v2, %v1692_v31  ;;  %v1424_v16 = vadd.f32 %v1423_v62, %v1361_v39  ;;  %v3555_v21 = vadd.f32 %v3408_v45, %v3461_v55  ;;  %v1364_v60 = vmul.f32 %v3535_v24, %v3535_v24  ;;  %1161 = vst [vmem:[#allocation2 + $0x30] sm:$0xff] %v1097_v6 }
 0x18d   : > { %2601 = vst [vmem:[%s3372_s1 + $0x58] sm:$0xff] %v2489_v1   ;;  %v1698_v41 = vsel %vm1570_vm10, %v1506_v36, %v1634_v22  ;;  %v1289_v26 = vadd.f32 %v1288_v58, %v1094_v18  ;;  %v1507_v20 = vadd.f32 %v3408_v45, %v1097_v6  ;;  %v2709_v27 = vpop.f32.mrf.mxu0  ;;  %v1095_v30 = vadd.f32 %v914_v42, %v422_v37  ;;  %v3575_v51 = vpop.f32.mrf.mxu1 }
 0x18e   : > { %2600 = vst [vmem:[%s3372_s1 + $0x50] sm:$0xff] %v2484_v11   ;;  %v1425_v29 = vadd.f32 %v1424_v16, %v1362_v12  ;;  %v3565_v19 = vadd.f32 %v2708_v52, %v427_v7  ;;  %v1098_v31 = vadd.f32 %v927_v9, %v425_v40  ;;  %v1632_v32 = vmul.f32 0.2, %v1504_v0  ;;  %v426_v40 = vld [vmem:[#allocation2] sm:$0xff] }
 0x18f   : > { %vm1571_vm11 = vcmp.ge.f32.partialorder %v1507_v20, 0.0  ;;  %v1635_v35 = vmul.f32 0.2, %v1507_v20  ;;  %v3567_v39 = vadd.f32 %v2709_v27, %v428_v17  ;;  %vm1568_vm12 = vcmp.ge.f32.partialorder %v1504_v0, 0.0  ;;  %1159 = vst [vmem:[#allocation2 + $0xf8] sm:$0xff] %v1095_v30  ;;  %v930_v9 = vpop.f32.mrf.mxu0  ;;  %v430_v17 = vld [vmem:[#allocation2 + $0x1d0] sm:$0xff] }
 0x190   : > { %v1290_v18 = vadd.f32 %v1289_v26, %v1095_v30  ;;  %v1363_v36 = vmul.f32 %v1095_v30, %v1095_v30  ;;  %v1505_v43 = vadd.f32 %v3408_v45, %v1095_v30  ;;  %1164 = vst [vmem:[#allocation2 + $0xf0] sm:$0xff] %v3565_v19  ;;  %1162 = vst [vmem:[#allocation2 + $0x1e0] sm:$0xff] %v1098_v31  ;;  %v3582_v26 = vpop.f32.mrf.mxu1  ;;  %vm1579_vm0 = vcmp.ge.f32.partialorder %v3555_v21, 0.0 }
 0x191   : > { %v1365_v46 = vmul.f32 %v1097_v6, %v1097_v6  ;;  %v1699_v42 = vsel %vm1571_vm11, %v1507_v20, %v1635_v35  ;;  %v1510_v48 = vadd.f32 %v3408_v45, %v3565_v19  ;;  %v1508_v50 = vadd.f32 %v3408_v45, %v1098_v31  ;;  %1165 = vst [vmem:[#allocation2 + $0x8] sm:$0xff] %v3567_v39 }
 0x192   : > { %v2499_v52 = vpack.c.bf16 %v1699_v42, %v1698_v41  ;;  %v1291_v61 = vadd.f32 %v1290_v18, %v3535_v24  ;;  %v1426_v62 = vadd.f32 %v1425_v29, %v1363_v36  ;;  %vm1569_vm13 = vcmp.ge.f32.partialorder %v1505_v43, 0.0  ;;  %v435_v41 = vld [vmem:[#allocation2 + $0x20] sm:$0xff] }
 0x193   : > { %v1696_v22 = vsel %vm1568_vm12, %v1504_v0, %v1632_v32  ;;  %v1633_v1 = vmul.f32 0.2, %v1505_v43  ;;  %vm1574_vm14 = vcmp.ge.f32.partialorder %v1510_v48, 0.0  ;;  %v1638_v2 = vmul.f32 0.2, %v1510_v48  ;;  %v433_v0 = vld [vmem:[#allocation2 + $0x40] sm:$0xff] }
 0x194   : > { %2603 = vst [vmem:[%s3372_s1 + $0x68] sm:$0xff] %v2499_v52   ;;  %v1427_v58 = vadd.f32 %v1426_v62, %v1364_v60  ;;  %v1292_v37 = vadd.f32 %v1291_v61, %v1097_v6  ;;  %v1366_v7 = vmul.f32 %v1098_v31, %v1098_v31  ;;  %vm1572_vm15 = vcmp.ge.f32.partialorder %v1508_v50, 0.0 }
 0x195   : > { %v1697_v11 = vsel %vm1569_vm13, %v1505_v43, %v1633_v1  ;;  %v1702_v12 = vsel %vm1574_vm14, %v1510_v48, %v1638_v2  ;;  %v1636_v16 = vmul.f32 0.2, %v1508_v50  ;;  %v1511_v24 = vadd.f32 %v3408_v45, %v3567_v39  ;;  %v3595_v48 = vpop.f32.mrf.mxu1 }
 0x196   : > { %v2494_v20 = vpack.c.bf16 %v1697_v11, %v1696_v22  ;;  %v1293_v27 = vadd.f32 %v1292_v37, %v1098_v31  ;;  %v1428_v60 = vadd.f32 %v1427_v58, %v1365_v46  ;;  %v1643_v29 = vmul.f32 0.2, %v3555_v21  ;;  %v436_v11 = vld [vmem:[#allocation2 + $0x128] sm:$0xff] }
 0x197   : > { %vm1575_vm1 = vcmp.ge.f32.partialorder %v1511_v24, 0.0  ;;  %v1639_v6 = vmul.f32 0.2, %v1511_v24  ;;  %v1099_v30 = vadd.f32 %v930_v9, %v426_v40  ;;  %v1103_v35 = vadd.f32 %v3428_v4, %v430_v17  ;;  %v3613_v40 = vpop.f32.mrf.mxu1 }
 0x198   : > { %2602 = vst [vmem:[%s3372_s1 + $0x60] sm:$0xff] %v2494_v20   ;;  %v1429_v32 = vadd.f32 %v1428_v60, %v1366_v7  ;;  %v3589_v18 = vadd.f32 %v3438_v13, %v435_v41  ;;  %v3592_v36 = vadd.f32 %v3445_v23, %v433_v0  ;;  %v1707_v31 = vsel %vm1579_vm0, %v3555_v21, %v1643_v29  ;;  %v437_v0 = vld [vmem:[#allocation2 + $0x1a0] sm:$0xff]  ;;  %v440_v20 = vld [vmem:[#allocation2 + $0x78] sm:$0xff] }
 0x199   : > { %v1703_v43 = vsel %vm1575_vm1, %v1511_v24, %v1639_v6  ;;  %1163 = vst [vmem:[#allocation2] sm:$0xff] %v1099_v30  ;;  %v1294_v46 = vadd.f32 %v1293_v27, %v1099_v30  ;;  %v1367_v42 = vmul.f32 %v1099_v30, %v1099_v30  ;;  %v1368_v52 = vmul.f32 %v3565_v19, %v3565_v19 }
 0x19a   : > { %v2509_v4 = vpack.c.bf16 %v1703_v43, %v1702_v12  ;;  %v2519_v13 = vpack.c.bf16 %v1707_v31, %v3457_v54  ;;  %v1509_v61 = vadd.f32 %v3408_v45, %v1099_v30  ;;  %1167 = vst [vmem:[#allocation2 + $0x1d0] sm:$0xff] %v1103_v35  ;;  %1172 = vst [vmem:[#allocation2 + $0x20] sm:$0xff] %v3589_v18  ;;  %v434_v12 = vld [vmem:[#allocation2 + $0x1f8] sm:$0xff] }
 0x19b   : > { %1170 = vst [vmem:[#allocation2 + $0x40] sm:$0xff] %v3592_v36  ;;  %v1369_v23 = vmul.f32 %v3567_v39, %v3567_v39  ;;  %v1295_v21 = vadd.f32 %v1294_v46, %v3565_v19  ;;  %v1430_v62 = vadd.f32 %v1429_v32, %v1367_v42  ;;  %v1513_v22 = vadd.f32 %v3408_v45, %v1103_v35 }
 0x19c   : > { %v1700_v1 = vsel %vm1572_vm15, %v1508_v50, %v1636_v16  ;;  %2605 = vst [vmem:[%s3372_s1 + $0x78] sm:$0xff] %v2509_v4   ;;  %2607 = vst [vmem:[%s3372_s1 + $0x88] sm:$0xff] %v2519_v13   ;;  %vm1573_vm2 = vcmp.ge.f32.partialorder %v1509_v61, 0.0  ;;  %v1637_v54 = vmul.f32 0.2, %v1509_v61  ;;  %v1518_v2 = vadd.f32 %v3408_v45, %v3589_v18 }
 0x19d   : > { %v1431_v58 = vadd.f32 %v1430_v62, %v1368_v52  ;;  %v1296_v37 = vadd.f32 %v1295_v21, %v3567_v39  ;;  %vm1577_vm3 = vcmp.ge.f32.partialorder %v1513_v22, 0.0  ;;  %v1641_v7 = vmul.f32 0.2, %v1513_v22  ;;  %v439_v39 = vld [vmem:[#allocation2 + $0xe8] sm:$0xff] }
 0x19e   : > { %v1701_v19 = vsel %vm1573_vm2, %v1509_v61, %v1637_v54  ;;  %v1371_v9 = vmul.f32 %v1103_v35, %v1103_v35  ;;  %vm1582_vm4 = vcmp.ge.f32.partialorder %v1518_v2, 0.0  ;;  %v1516_v50 = vadd.f32 %v3408_v45, %v3592_v36 }
 0x19f   : > { %v2504_v16 = vpack.c.bf16 %v1701_v19, %v1700_v1  ;;  %v1297_v24 = vadd.f32 %v1296_v37, %v3418_v59  ;;  %v1432_v17 = vadd.f32 %v1431_v58, %v1369_v23  ;;  %v1705_v41 = vsel %vm1577_vm3, %v1513_v22, %v1641_v7  ;;  %v3623_v59 = vpop.f32.mrf.mxu1  ;;  %v443_v19 = vld [vmem:[#allocation2 + $0x1d8] sm:$0xff] }
 0x1a0   : > { %v2514_v27 = vpack.c.bf16 %v1705_v41, %v3484_v47  ;;  %v1646_v60 = vmul.f32 0.2, %v1518_v2  ;;  %vm1580_vm5 = vcmp.ge.f32.partialorder %v1516_v50, 0.0  ;;  %v1644_v6 = vmul.f32 0.2, %v1516_v50 }
 0x1a1   : > { %2604 = vst [vmem:[%s3372_s1 + $0x70] sm:$0xff] %v2504_v16   ;;  %v1298_v29 = vadd.f32 %v1297_v24, %v1103_v35  ;;  %v1433_v30 = vadd.f32 %v1432_v17, %v3434_v8  ;;  %v1109_v32 = vadd.f32 %v3449_v33, %v436_v11  ;;  %v1107_v43 = vadd.f32 %v3463_v56, %v434_v12  ;;  %v3651_v61 = vpop.f32.mrf.mxu1 }
 0x1a2   : > { %2606 = vst [vmem:[%s3372_s1 + $0x80] sm:$0xff] %v2514_v27   ;;  %v1376_v31 = vmul.f32 %v3589_v18, %v3589_v18  ;;  %v3629_v46 = vadd.f32 %v3470_v14, %v439_v39  ;;  %v3632_v47 = vadd.f32 %v3475_v38, %v437_v0  ;;  %v3635_v35 = vadd.f32 %v3492_v63, %v440_v20 }
 0x1a3   : > { %v1299_v8 = vadd.f32 %v1298_v29, %v3410_v49  ;;  %v1434_v33 = vadd.f32 %v1433_v30, %v1371_v9  ;;  %v1374_v56 = vmul.f32 %v3592_v36, %v3592_v36  ;;  %1173 = vst [vmem:[#allocation2 + $0x128] sm:$0xff] %v1109_v32  ;;  %v1519_v42 = vadd.f32 %v3408_v45, %v1109_v32  ;;  %v441_v9 = vld [vmem:[#allocation2 + $0x70] sm:$0xff]  ;;  %v3676_v29 = vld [vmem:[#allocation8] ss:$0 sm:$0xff] }
 0x1a4   : > { %1171 = vst [vmem:[#allocation2 + $0x1f8] sm:$0xff] %v1107_v43  ;;  %v1710_v52 = vsel %vm1582_vm4, %v1518_v2, %v1646_v60  ;;  %v1708_v14 = vsel %vm1580_vm5, %v1516_v50, %v1644_v6  ;;  %v1517_v38 = vadd.f32 %v3408_v45, %v1107_v43  ;;  %1176 = vst [vmem:[#allocation2 + $0xe8] sm:$0xff] %v3629_v46 }
 0x1a5   : > { %v1522_v63 = vadd.f32 %v3408_v45, %v3629_v46  ;;  %1174 = vst [vmem:[#allocation2 + $0x1a0] sm:$0xff] %v3632_v47  ;;  %1177 = vst [vmem:[#allocation2 + $0x78] sm:$0xff] %v3635_v35  ;;  %v1435_v49 = vadd.f32 %v1434_v33, %v3425_v3  ;;  %v1300_v4 = vadd.f32 %v1299_v8, %v3461_v55  ;;  %vm1583_vm6 = vcmp.ge.f32.partialorder %v1519_v42, 0.0  ;;  %v438_v3 = vld [vmem:[#allocation2 + $0x1f0] sm:$0xff] }
 0x1a6   : > { %v1647_v13 = vmul.f32 0.2, %v1519_v42  ;;  %v1377_v23 = vmul.f32 %v1109_v32, %v1109_v32  ;;  %v1375_v21 = vmul.f32 %v1107_v43, %v1107_v43  ;;  %vm1581_vm7 = vcmp.ge.f32.partialorder %v1517_v38, 0.0 }
 0x1a7   : > { %v1645_v62 = vmul.f32 0.2, %v1517_v38  ;;  %v1301_v22 = vadd.f32 %v1300_v4, %v3592_v36  ;;  %v1436_v1 = vadd.f32 %v1435_v49, %v3539_v57  ;;  %v3657_v2 = vmul.f32 %v3629_v46, %v3629_v46  ;;  %v3661_v57 = vpop.f32.mrf.mxu1 }
 0x1a8   : > { %v1711_v54 = vsel %vm1583_vm6, %v1519_v42, %v1647_v13  ;;  %v1650_v37 = vmul.f32 0.2, %v1522_v63  ;;  %v1520_v7 = vadd.f32 %v3408_v45, %v3632_v47  ;;  %vm1586_vm8 = vcmp.ge.f32.partialorder %v1522_v63, 0.0  ;;  %v442_v42 = vld [vmem:[#allocation2 + $0x90] sm:$0xff] }
 0x1a9   : > { %v2529_v55 = vpack.c.bf16 %v1711_v54, %v1710_v52  ;;  %v1709_v58 = vsel %vm1581_vm7, %v1517_v38, %v1645_v62  ;;  %v1437_v50 = vadd.f32 %v1436_v1, %v1374_v56  ;;  %v1302_v36 = vadd.f32 %v1301_v22, %v1107_v43  ;;  %v447_v52 = vld [vmem:[#allocation2 + $0xa8] sm:$0xff] }
 0x1aa   : > { %v2524_v11 = vpack.c.bf16 %v1709_v58, %v1708_v14  ;;  %vm1584_vm9 = vcmp.ge.f32.partialorder %v1520_v7, 0.0  ;;  %v1648_v12 = vmul.f32 0.2, %v1520_v7  ;;  %v1523_v16 = vadd.f32 %v3408_v45, %v3635_v35 }
 0x1ab   : > { %2609 = vst [vmem:[%s3372_s1 + $0x98] sm:$0xff] %v2529_v55   ;;  %v1111_v24 = vadd.f32 %v3495_v25, %v438_v3  ;;  %v1303_v17 = vadd.f32 %v1302_v36, %v3589_v18  ;;  %v1438_v41 = vadd.f32 %v1437_v50, %v1375_v21  ;;  %v3670_v39 = vadd.f32 %v3506_v44, %v443_v19  ;;  %v3680_v44 = vpop.f32.mrf.mxu1  ;;  %v448_v50 = vld [vmem:[#allocation2 + $0x1c8] sm:$0xff] }
 0x1ac   : > { %2608 = vst [vmem:[%s3372_s1 + $0x90] sm:$0xff] %v2524_v11   ;;  %v1114_v0 = vadd.f32 %v3518_v10, %v441_v9  ;;  %v1714_v20 = vsel %vm1586_vm8, %v1522_v63, %v1650_v37  ;;  %v1378_v27 = vmul.f32 %v3632_v47, %v3632_v47  ;;  %vm1587_vm10 = vcmp.ge.f32.partialorder %v1523_v16, 0.0  ;;  %v445_v9 = vld [vmem:[#allocation2 + $0xb8] sm:$0xff] }
 0x1ad   : > { %v1651_v60 = vmul.f32 0.2, %v1523_v16  ;;  %1175 = vst [vmem:[#allocation2 + $0x1f0] sm:$0xff] %v1111_v24  ;;  %v1439_v6 = vadd.f32 %v1438_v41, %v1376_v31  ;;  %v1304_v45 = vadd.f32 %v1303_v17, %v1109_v32  ;;  %v1712_v25 = vsel %vm1584_vm9, %v1520_v7, %v1648_v12  ;;  %1180 = vst [vmem:[#allocation2 + $0x1d8] sm:$0xff] %v3670_v39  ;;  %v444_v32 = vld [vmem:[#allocation2 + $0xd0] sm:$0xff]  ;;  %v3690_v21 = vpop.f32.mrf.mxu1 }
 0x1ae   : > { %v1521_v18 = vadd.f32 %v3676_v29, %v1111_v24  ;;  %1178 = vst [vmem:[#allocation2 + $0x70] sm:$0xff] %v1114_v0  ;;  %v1379_v30 = vmul.f32 %v1111_v24, %v1111_v24  ;;  %v1526_v43 = vadd.f32 %v3676_v29, %v3670_v39  ;;  %v1524_v31 = vadd.f32 %v3676_v29, %v1114_v0 }
 0x1af   : > { %v1715_v10 = vsel %vm1587_vm10, %v1523_v16, %v1651_v60  ;;  %v1305_v8 = vadd.f32 %v1304_v45, %v3632_v47  ;;  %v1440_v33 = vadd.f32 %v1439_v6, %v1377_v23  ;;  %v3688_v13 = vadd.f32 %v3523_v34, %v444_v32  ;;  %v3711_v36 = vpop.f32.mrf.mxu1 }
 0x1b0   : > { %v2539_v56 = vpack.c.bf16 %v1715_v10, %v1714_v20  ;;  %vm1585_vm11 = vcmp.ge.f32.partialorder %v1521_v18, 0.0  ;;  %v1649_v14 = vmul.f32 0.2, %v1521_v18  ;;  %vm1590_vm12 = vcmp.ge.f32.partialorder %v1526_v43, 0.0  ;;  %v449_v10 = vld [vmem:[#allocation2 + $0x170] sm:$0xff] }
 0x1b1   : > { %v1654_v38 = vmul.f32 0.2, %v1526_v43  ;;  %vm1588_vm13 = vcmp.ge.f32.partialorder %v1524_v31, 0.0  ;;  %v1441_v63 = vadd.f32 %v1440_v33, %v1378_v27  ;;  %v1306_v49 = vadd.f32 %v1305_v8, %v1111_v24  ;;  %1181 = vst [vmem:[#allocation2 + $0xd0] sm:$0xff] %v3688_v13  ;;  %v446_v27 = vld [vmem:[#allocation2 + $0x88] sm:$0xff] }
 0x1b2   : > { %2611 = vst [vmem:[%s3372_s1 + $0xa8] sm:$0xff] %v2539_v56   ;;  %v1652_v4 = vmul.f32 0.2, %v1524_v31  ;;  %v1381_v47 = vmul.f32 %v3635_v35, %v3635_v35  ;;  %v1713_v23 = vsel %vm1585_vm11, %v1521_v18, %v1649_v14  ;;  %v1115_v62 = vadd.f32 %v3530_v5, %v442_v42  ;;  %v451_v18 = vld [vmem:[#allocation2 + $0x68] sm:$0xff]  ;;  %v452_v14 = vld [vmem:[#allocation2 + $0x190] sm:$0xff] }
 0x1b3   : > { %v3696_v22 = vadd.f32 %v3541_v28, %v447_v52  ;;  %v1307_v1 = vadd.f32 %v1306_v49, %v3629_v46  ;;  %v1442_v54 = vadd.f32 %v1441_v63, %v1379_v30  ;;  %v2534_v3 = vpack.c.bf16 %v1713_v23, %v1712_v25 }
 0x1b4   : > { %v1382_v55 = vmul.f32 %v1114_v0, %v1114_v0  ;;  %v1718_v34 = vsel %vm1590_vm12, %v1526_v43, %v1654_v38  ;;  %v1716_v58 = vsel %vm1588_vm13, %v1524_v31, %v1652_v4  ;;  %v1527_v37 = vadd.f32 %v3676_v29, %v3688_v13  ;;  %1179 = vst [vmem:[#allocation2 + $0x90] sm:$0xff] %v1115_v62 }
 0x1b5   : > { %v1525_v5 = vadd.f32 %v3676_v29, %v1115_v62  ;;  %1184 = vst [vmem:[#allocation2 + $0xa8] sm:$0xff] %v3696_v22  ;;  %v1443_v28 = vadd.f32 %v1442_v54, %v3657_v2  ;;  %2610 = vst [vmem:[%s3372_s1 + $0xa0] sm:$0xff] %v2534_v3   ;;  %v1308_v46 = vadd.f32 %v1307_v1, %v3635_v35  ;;  %v455_v54 = vld [vmem:[#allocation2 + $0xc0] sm:$0xff]  ;;  %v453_v3 = vld [vmem:[#allocation2 + $0x198] sm:$0xff] }
 0x1b6   : > { %v1383_v7 = vmul.f32 %v1115_v62, %v1115_v62  ;;  %v1530_v19 = vadd.f32 %v3676_v29, %v3696_v22  ;;  %vm1591_vm14 = vcmp.ge.f32.partialorder %v1527_v37, 0.0  ;;  %v1655_v11 = vmul.f32 0.2, %v1527_v37 }
 0x1b7   : > { %vm1589_vm15 = vcmp.ge.f32.partialorder %v1525_v5, 0.0  ;;  %v1653_v12 = vmul.f32 0.2, %v1525_v5  ;;  %v1309_v16 = vadd.f32 %v1308_v46, %v1114_v0  ;;  %v1444_v24 = vadd.f32 %v1443_v28, %v1381_v47  ;;  %v3717_v0 = vpop.f32.mrf.mxu1  ;;  %v459_v28 = vld [vmem:[#allocation2 + $0x58] sm:$0xff] }
 0x1b8   : > { %vm1594_vm0 = vcmp.ge.f32.partialorder %v1530_v19, 0.0  ;;  %v1658_v17 = vmul.f32 0.2, %v1530_v19  ;;  %v1719_v2 = vsel %vm1591_vm14, %v1527_v37, %v1655_v11  ;;  %v1118_v35 = vadd.f32 %v3550_v53, %v445_v9  ;;  %v460_v9 = vld [vmem:[#allocation2 + $0xa0] sm:$0xff] }
 0x1b9   : > { %v1717_v41 = vsel %vm1589_vm15, %v1525_v5, %v1653_v12  ;;  %v3715_v20 = vadd.f32 %v3562_v15, %v448_v50  ;;  %v1445_v60 = vadd.f32 %v1444_v24, %v1382_v55  ;;  %v2549_v6 = vpack.c.bf16 %v1719_v2, %v1718_v34  ;;  %v2741_v49 = vpop.f32.mrf.mxu1  ;;  %v456_v55 = vld [vmem:[#allocation2 + $0x1c0] sm:$0xff]  ;;  %v454_v5 = vld [vmem:[#allocation2 + $0x38] sm:$0xff]  ;;  %v458_v50 = vld [vmem:[#allocation2 + $0x10] sm:$0xff] }
 0x1ba   : > { %v1310_v45 = vadd.f32 %v1309_v16, %v1115_v62  ;;  %v2544_v25 = vpack.c.bf16 %v1717_v41, %v1716_v58  ;;  %v1384_v30 = vmul.f32 %v3670_v39, %v3670_v39  ;;  %v1385_v53 = vmul.f32 %v3688_v13, %v3688_v13  ;;  %1182 = vst [vmem:[#allocation2 + $0xb8] sm:$0xff] %v1118_v35 }
 0x1bb   : > { %v1722_v43 = vsel %vm1594_vm0, %v1530_v19, %v1658_v17  ;;  %v1528_v15 = vadd.f32 %v3676_v29, %v1118_v35  ;;  %1185 = vst [vmem:[#allocation2 + $0x1c8] sm:$0xff] %v3715_v20  ;;  %2613 = vst [vmem:[%s3372_s1 + $0xb8] sm:$0xff] %v2549_v6   ;;  %v1446_v32 = vadd.f32 %v1445_v60, %v1383_v7  ;;  %v1058_v11 = vpop.f32.mrf.mxu1 }
 0x1bc   : > { %v1311_v31 = vadd.f32 %v1310_v45, %v3670_v39  ;;  %2612 = vst [vmem:[%s3372_s1 + $0xb0] sm:$0xff] %v2544_v25   ;;  %v1531_v8 = vadd.f32 %v3676_v29, %v3715_v20  ;;  %v1119_v33 = vadd.f32 %v3575_v51, %v446_v27  ;;  %v3733_v42 = vadd.f32 %v3582_v26, %v451_v18 }
 0x1bd   : > { %vm1592_vm1 = vcmp.ge.f32.partialorder %v1528_v15, 0.0  ;;  %v1656_v56 = vmul.f32 0.2, %v1528_v15  ;;  %v3736_v52 = vadd.f32 %v3595_v48, %v449_v10  ;;  %v1447_v38 = vadd.f32 %v1446_v32, %v1384_v30  ;;  %v450_v48 = vld [vmem:[#allocation2 + $0x178] sm:$0xff] }
 0x1be   : > { %v1312_v63 = vadd.f32 %v1311_v31, %v3688_v13  ;;  %vm1595_vm2 = vcmp.ge.f32.partialorder %v1531_v8, 0.0  ;;  %v1659_v39 = vmul.f32 0.2, %v1531_v8  ;;  %1183 = vst [vmem:[#allocation2 + $0x88] sm:$0xff] %v1119_v33  ;;  %v1386_v4 = vmul.f32 %v1118_v35, %v1118_v35  ;;  %1188 = vst [vmem:[#allocation2 + $0x68] sm:$0xff] %v3733_v42 }
 0x1bf   : > { %v1720_v47 = vsel %vm1592_vm1, %v1528_v15, %v1656_v56  ;;  %v1529_v51 = vadd.f32 %v3676_v29, %v1119_v33  ;;  %1186 = vst [vmem:[#allocation2 + $0x170] sm:$0xff] %v3736_v52  ;;  %v3744_v26 = vadd.f32 %v3676_v29, %v3736_v52  ;;  %v1448_v62 = vadd.f32 %v1447_v38, %v1385_v53 }
 0x1c0   : > { %v1313_v23 = vadd.f32 %v1312_v63, %v1118_v35  ;;  %v1723_v13 = vsel %vm1595_vm2, %v1531_v8, %v1659_v39  ;;  %v3747_v1 = vadd.f32 %v3613_v40, %v452_v14  ;;  %v1387_v58 = vmul.f32 %v1119_v33, %v1119_v33  ;;  %v457_v40 = vld [vmem:[#allocation2 + $0x158] sm:$0xff] }
 0x1c1   : > { %v2559_v34 = vpack.c.bf16 %v1723_v13, %v1722_v43  ;;  %vm1593_vm3 = vcmp.ge.f32.partialorder %v1529_v51, 0.0  ;;  %v1657_v37 = vmul.f32 0.2, %v1529_v51  ;;  %v1449_v46 = vadd.f32 %v1448_v62, %v1386_v4 }
 0x1c2   : > { %v1314_v7 = vadd.f32 %v1313_v23, %v1119_v33  ;;  %vm1596_vm4 = vcmp.ge.f32.partialorder %v3744_v26, 0.0  ;;  %1189 = vst [vmem:[#allocation2 + $0x190] sm:$0xff] %v3747_v1  ;;  %v3752_v19 = vadd.f32 %v3623_v59, %v450_v48  ;;  %v3756_v16 = vadd.f32 %v3651_v61, %v455_v54 }
 0x1c3   : > { %2615 = vst [vmem:[%s3372_s1 + $0xc8] sm:$0xff] %v2559_v34   ;;  %v1721_v12 = vsel %vm1593_vm3, %v1529_v51, %v1657_v37  ;;  %v3759_v24 = vadd.f32 %v3661_v57, %v453_v3  ;;  %v3762_v17 = vadd.f32 %v3680_v44, %v456_v55  ;;  %v3764_v2 = vadd.f32 %v1449_v46, %v1387_v58 }
 0x1c4   : > { %v2554_v59 = vpack.c.bf16 %v1721_v12, %v1720_v47  ;;  %v1660_v41 = vmul.f32 0.2, %v3744_v26  ;;  %1187 = vst [vmem:[#allocation2 + $0x178] sm:$0xff] %v3752_v19  ;;  %v3769_v35 = vadd.f32 %v3690_v21, %v454_v5  ;;  %1192 = vst [vmem:[#allocation2 + $0xc0] sm:$0xff] %v3756_v16  ;;  %v3775_v61 = vadd.f32 %v3711_v36, %v459_v28 }
 0x1c5   : > { %1190 = vst [vmem:[#allocation2 + $0x198] sm:$0xff] %v3759_v24  ;;  %1193 = vst [vmem:[#allocation2 + $0x1c0] sm:$0xff] %v3762_v17  ;;  %v3778_v57 = vadd.f32 %v3717_v0, %v457_v40  ;;  %v3780_v44 = vadd.f32 %v2741_v49, %v460_v9  ;;  %v3782_v27 = vadd.f32 %v1058_v11, %v458_v50 }
 0x1c6   : > { %2614 = vst [vmem:[%s3372_s1 + $0xc0] sm:$0xff] %v2554_v59   ;;  %1191 = vst [vmem:[#allocation2 + $0x38] sm:$0xff] %v3769_v35  ;;  %v1315_v21 = vadd.f32 %v1314_v7, %v3696_v22  ;;  %v1533_v60 = vadd.f32 %v3676_v29, %v3752_v19  ;;  %v1534_v6 = vadd.f32 %v3676_v29, %v3733_v42 }
 0x1c7   : > { %v1535_v36 = vadd.f32 %v3676_v29, %v3747_v1  ;;  %1196 = vst [vmem:[#allocation2 + $0x58] sm:$0xff] %v3775_v61  ;;  %1194 = vst [vmem:[#allocation2 + $0x158] sm:$0xff] %v3778_v57  ;;  %v1536_v45 = vadd.f32 %v3676_v29, %v3759_v24  ;;  %v1537_v25 = vadd.f32 %v3676_v29, %v3769_v35 }
 0x1c8   : > { %1197 = vst [vmem:[#allocation2 + $0xa0] sm:$0xff] %v3780_v44  ;;  %1195 = vst [vmem:[#allocation2 + $0x10] sm:$0xff] %v3782_v27  ;;  %v1538_v18 = vadd.f32 %v3676_v29, %v3756_v16  ;;  %v1539_v10 = vadd.f32 %v3676_v29, %v3762_v17  ;;  %v1316_v0 = vadd.f32 %v1315_v21, %v3715_v20  ;;  %vm1597_vm5 = vcmp.ge.f32.partialorder %v1533_v60, 0.0 }
 0x1c9   : > { %v1540_v30 = vadd.f32 %v3676_v29, %v3778_v57  ;;  %v1541_v53 = vadd.f32 %v3676_v29, %v3782_v27  ;;  %v1542_v43 = vadd.f32 %v3676_v29, %v3775_v61  ;;  %v1543_v15 = vadd.f32 %v3676_v29, %v3780_v44 }
 0x1ca   : > { %vm1598_vm6 = vcmp.ge.f32.partialorder %v1534_v6, 0.0  ;;  %vm1599_vm7 = vcmp.ge.f32.partialorder %v1535_v36, 0.0  ;;  %v1317_v31 = vadd.f32 %v1316_v0, %v3736_v52  ;;  %vm1600_vm8 = vcmp.ge.f32.partialorder %v1536_v45, 0.0 }
 0x1cb   : > { %vm1601_vm9 = vcmp.ge.f32.partialorder %v1537_v25, 0.0  ;;  %vm1602_vm10 = vcmp.ge.f32.partialorder %v1538_v18, 0.0  ;;  %vm1603_vm11 = vcmp.ge.f32.partialorder %v1539_v10, 0.0  ;;  %vm1604_vm12 = vcmp.ge.f32.partialorder %v1540_v30, 0.0 }
 0x1cc   : > { %vm1605_vm13 = vcmp.ge.f32.partialorder %v1541_v53, 0.0  ;;  %vm1606_vm14 = vcmp.ge.f32.partialorder %v1542_v43, 0.0  ;;  %v1318_v32 = vadd.f32 %v1317_v31, %v3752_v19  ;;  %vm1607_vm15 = vcmp.ge.f32.partialorder %v1543_v15, 0.0 }
 0x1cd   : > { %v1661_v8 = vmul.f32 0.2, %v1533_v60  ;;  %v1662_v33 = vmul.f32 0.2, %v1534_v6  ;;  %v1724_v29 = vsel %vm1596_vm4, %v3744_v26, %v1660_v41  ;;  %v1663_v56 = vmul.f32 0.2, %v1535_v36 }
 0x1ce   : > { %v1664_v14 = vmul.f32 0.2, %v1536_v45  ;;  %v1665_v38 = vmul.f32 0.2, %v1537_v25  ;;  %v1319_v63 = vadd.f32 %v1318_v32, %v3733_v42  ;;  %v1666_v39 = vmul.f32 0.2, %v1538_v18 }
 0x1cf   : > { %v1667_v49 = vmul.f32 0.2, %v1539_v10  ;;  %v1668_v4 = vmul.f32 0.2, %v1540_v30  ;;  %v1669_v47 = vmul.f32 0.2, %v1541_v53  ;;  %v1725_v23 = vsel %vm1597_vm5, %v1533_v60, %v1661_v8 }
 0x1d0   : > { %v1670_v51 = vmul.f32 0.2, %v1542_v43  ;;  %v1671_v48 = vmul.f32 0.2, %v1543_v15  ;;  %v1320_v62 = vadd.f32 %v1319_v63, %v3747_v1  ;;  %v1726_v13 = vsel %vm1598_vm6, %v1534_v6, %v1662_v33 }
 0x1d1   : > { %v1727_v26 = vsel %vm1599_vm7, %v1535_v36, %v1663_v56  ;;  %v1728_v54 = vsel %vm1600_vm8, %v1536_v45, %v1664_v14  ;;  %v1729_v3 = vsel %vm1601_vm9, %v1537_v25, %v1665_v38  ;;  %v1730_v55 = vsel %vm1602_vm10, %v1538_v18, %v1666_v39 }
 0x1d2   : > { %v1731_v34 = vsel %vm1603_vm11, %v1539_v10, %v1667_v49  ;;  %v1732_v58 = vsel %vm1604_vm12, %v1540_v30, %v1668_v4  ;;  %v1321_v37 = vadd.f32 %v1320_v62, %v3759_v24  ;;  %v1733_v5 = vsel %vm1605_vm13, %v1541_v53, %v1669_v47 }
 0x1d3   : > { %v1734_v28 = vsel %vm1606_vm14, %v1542_v43, %v1670_v51  ;;  %v1735_v46 = vsel %vm1607_vm15, %v1543_v15, %v1671_v48  ;;  %v2564_v7 = vpack.c.bf16 %v1725_v23, %v1724_v29  ;;  %v2569_v40 = vpack.c.bf16 %v1727_v26, %v1726_v13 }
 0x1d4   : > { %v2574_v9 = vpack.c.bf16 %v1729_v3, %v1728_v54  ;;  %v2579_v50 = vpack.c.bf16 %v1731_v34, %v1730_v55  ;;  %v1322_v11 = vadd.f32 %v1321_v37, %v3769_v35  ;;  %v2584_v12 = vpack.c.bf16 %v1733_v5, %v1732_v58 }
 0x1d5   : > { %v2589_v59 = vpack.c.bf16 %v1735_v46, %v1734_v28  ;;  %v1388_v41 = vmul.f32 %v3696_v22, %v3696_v22  ;;  %2616 = vst [vmem:[%s3372_s1 + $0xd0] sm:$0xff] %v2564_v7   ;;  %2617 = vst [vmem:[%s3372_s1 + $0xd8] sm:$0xff] %v2569_v40   ;;  %v1389_v60 = vmul.f32 %v3715_v20, %v3715_v20 }
 0x1d6   : > { %2618 = vst [vmem:[%s3372_s1 + $0xe0] sm:$0xff] %v2574_v9   ;;  %2619 = vst [vmem:[%s3372_s1 + $0xe8] sm:$0xff] %v2579_v50   ;;  %v1323_v21 = vadd.f32 %v1322_v11, %v3756_v16 }
 0x1d7   : > { %2620 = vst [vmem:[%s3372_s1 + $0xf0] sm:$0xff] %v2584_v12   ;;  %2621 = vst [vmem:[%s3372_s1 + $0xf8] sm:$0xff] %v2589_v59  }
 0x1d8   : > { %2995 = shalt.err (!%p2992_p9)
}
 0x1d9   : > { %s2996_s10 = scalar_lea.hbm %s3838_s12, 4096  ;;  %s3000_s17 = scalar_lea.hbm %s3950_s3, 131072 }
 0x1da   : > { %p2997_p11 = scmp.ne.s32.totalorder %s3838_s12, %s2996_s10  ;;  %p3001_p7 = scmp.lt.s32.totalorder %s3838_s12, %s3950_s3 }
 0x1db   : > { %p3002_p3 = scmp.lt.s32.totalorder %s3000_s17, %s2996_s10 }
 0x1dc   : > { %p2998_p12 = pnand %p2997_p11, %p3259_p5 }
 0x1dd   : > { %p3003_p2 = por %p3002_p3, %p3001_p7 }
 0x1de   : > { %p2999_p13 = pneg %p2998_p12 }
 0x1e0   : > { %p3004_p1 = pnand %p3003_p2, %p2999_p13 }
 0x1e2   : > { %3007 = shalt.err (!%p3004_p1)
}
 0x1e3   : > { %s3128_s26 = smov 64   ;;  %s3129_s21 = smov 4   ;;  %v1451_v22 = vadd.f32 %v3764_v2, %v1388_v41  ;;  %v1324_v20 = vadd.f32 %v1323_v21, %v3762_v17  ;;  %v1390_v6 = vmul.f32 %v3736_v52, %v3736_v52  ;;  %v1391_v25 = vmul.f32 %v3752_v19, %v3752_v19  ;;  %v1265_v49 = vld [vmem:[#allocation10] sm:$0x1] }
 0x1e4   : > { %2768 = dma.vmem_to_hbm [thread:$0]  (%p3259_p5), %s3841_s28, 4096, %s3838_s12, %s2057_s13, %s3128_s26, %s3128_s26, %s3129_s21   ;;  %v1392_v0 = vmul.f32 %v3733_v42, %v3733_v42  ;;  %v1393_v53 = vmul.f32 %v3747_v1, %v3747_v1  ;;  %v1394_v15 = vmul.f32 %v3759_v24, %v3759_v24  ;;  %v1395_v32 = vmul.f32 %v3769_v35, %v3769_v35 }
 0x1e5   : > { %v1452_v36 = vadd.f32 %v1451_v22, %v1389_v60  ;;  %v1325_v45 = vadd.f32 %v1324_v20, %v3778_v57  ;;  %v1396_v42 = vmul.f32 %v3756_v16, %v3756_v16  ;;  %v1397_v1 = vmul.f32 %v3762_v17, %v3762_v17  ;;  %s3130_s8 = smov [#allocation10]   ;;  %p3971_p4 = scmp.ne.s32.totalorder %s3960_s27, 0 }
 0x1e6   : > { %v1398_v24 = vmul.f32 %v3778_v57, %v3778_v57  ;;  %s2087_s11 = sshll.u32 %s3130_s8, 4  ;;  %v1399_v35 = vmul.f32 %v3782_v27, %v3782_v27  ;;  %v1400_v47 = vmul.f32 %v3775_v61, %v3775_v61  ;;  %v1401_v57 = vmul.f32 %v3780_v44, %v3780_v44  ;;  %s2088_s11 = int_to_ptr.vmem [resolvable:$true] %s2087_s11 }
 0x1e7   : > { %v1453_v18 = vadd.f32 %v1452_v36, %v1390_v6  ;;  %v1326_v10 = vadd.f32 %v1325_v45, %v3782_v27  ;;  %s3008_s28 = scalar_lea.vmem %s2088_s11, 16  ;;  %s3014_s30 = scalar_lea.vmem %s2088_s11, 32 }
 0x1e8   : > { %p3009_p5 = scmp.ne.s32.totalorder %s2088_s11, %s3008_s28  ;;  %p3015_p0 = scmp.lt.s32.totalorder %s2088_s11, %s2088_s11 }
 0x1e9   : > { %v1454_v30 = vadd.f32 %v1453_v18, %v1391_v25  ;;  %v1327_v2 = vadd.f32 %v1326_v10, %v3775_v61  ;;  %p3016_p10 = scmp.lt.s32.totalorder %s3014_s30, %s3008_s28 }
 0x1ea   : > { %p3010_p6 = pnand %p3009_p5, %p3971_p4 }
 0x1eb   : > { %v1455_v43 = vadd.f32 %v1454_v30, %v1392_v0  ;;  %v1328_v52 = vadd.f32 %v1327_v2, %v3780_v44  ;;  %p3017_p9 = por %p3016_p10, %p3015_p0 }
 0x1ec   : > { %p3011_p8 = pneg %p3010_p6 }
 0x1ed   : > { %v1456_v31 = vadd.f32 %v1455_v43, %v1393_v53  ;;  %v1329_v19 = vrot.slane %v1328_v52, 4 }
 0x1ee   : > { %p3018_p11 = pnand %p3017_p9, %p3011_p8 }
 0x1ef   : > { %v1457_v8 = vadd.f32 %v1456_v31, %v1394_v15  ;;  %v1330_v33 = vadd.f32 %v1329_v19, %v1328_v52 }
 0x1f1   : > { %v1458_v29 = vadd.f32 %v1457_v8, %v1395_v32  ;;  %v1331_v56 = vrot.slane %v1330_v33, 2 }
 0x1f3   : > { %v1459_v14 = vadd.f32 %v1458_v29, %v1396_v42  ;;  %v1332_v38 = vadd.f32 %v1331_v56, %v1330_v33 }
 0x1f5   : > { %v1460_v63 = vadd.f32 %v1459_v14, %v1397_v1  ;;  %v1333_v39 = vrot.slane %v1332_v38, 1 }
 0x1f7   : > { %v1461_v16 = vadd.f32 %v1460_v63, %v1398_v24  ;;  %v1334_v4 = vadd.f32 %v1333_v39, %v1332_v38 }
 0x1f9   : > { %v1462_v17 = vadd.f32 %v1461_v16, %v1399_v35  ;;  %v1335_v51 = vadd.f32 %v1334_v4, %v1265_v49 }
 0x1fb   : > { %v1463_v48 = vadd.f32 %v1462_v17, %v1400_v47  ;;  %1336 = vst [vmem:[#allocation10] sm:$0x1] %v1335_v51 }
 0x1fc   : > { %3021 = shalt.err (!%p3018_p11)
}
 0x1fd   : > { %2770 = dma.vmem_to_hbm [thread:$0]  (%p3971_p4), %s2088_s11, 16, %s3951_s4, [#allocation11]   ;;  %v1464_v61 = vadd.f32 %v1463_v48, %v1401_v57  ;;  %v1337_v26 = vld [vmem:[#allocation12] sm:$0x1] }
 0x1fe   : > { %s3131_s24 = smov [#allocation12]  }
 0x1ff   : > { %v1465_v44 = vrot.slane %v1464_v61, 4  ;;  %s2100_s9 = sshll.u32 %s3131_s24, 4  ;;  %s2101_s9 = int_to_ptr.vmem [resolvable:$true] %s2100_s9 }
 0x200   : > { %s3032_s7 = scalar_lea.vmem %s2101_s9, 16  ;;  %s3038_s14 = scalar_lea.vmem %s2101_s9, 32 }
 0x201   : > { %v1466_v27 = vadd.f32 %v1465_v44, %v1464_v61  ;;  %p3033_p12 = scmp.ne.s32.totalorder %s2101_s9, %s3032_s7  ;;  %p3039_p3 = scmp.lt.s32.totalorder %s2101_s9, %s2101_s9 }
 0x202   : > { %p3040_p2 = scmp.lt.s32.totalorder %s3038_s14, %s3032_s7 }
 0x203   : > { %v1467_v23 = vrot.slane %v1466_v27, 2  ;;  %p3034_p13 = pnand %p3033_p12, %p3971_p4 }
 0x204   : > { %p3041_p1 = por %p3040_p2, %p3039_p3 }
 0x205   : > { %v1468_v62 = vadd.f32 %v1467_v23, %v1466_v27  ;;  %p3035_p7 = pneg %p3034_p13 }
 0x207   : > { %v1469_v13 = vrot.slane %v1468_v62, 1  ;;  %p3042_p5 = pnand %p3041_p1, %p3035_p7 }
 0x209   : > { %v1470_v54 = vadd.f32 %v1469_v13, %v1468_v62 }
 0x20b   : > { %v1471_v3 = vadd.f32 %v1470_v54, %v1337_v26 }
 0x20d   : > { %1472 = vst [vmem:[#allocation12] sm:$0x1] %v1471_v3 }
 0x20e   : > { %3045 = shalt.err (!%p3042_p5)
}
 0x20f   : > { %2772 = dma.vmem_to_hbm [thread:$0]  (%p3971_p4), %s2101_s9, 16, %s3952_s5, [#allocation11]  }
 0x210   : > { %3089 = dma.done.wait (%p3971_p4), [#allocation11], 32  }
 0x211   : > { %3091 = vsyncadd (%p3971_p4), [#allocation11], 4294967264 }
 0x212 PF: > { %p2802_p6 = scmp.ge.s32.totalorder %s3118_s23, 2  ;;  %s2120_s2 = sand.u32 1, %s3098_s18  }
 0x213   : > { %p3972_p8 = scmp.ne.s32.totalorder %s3962_s29, 0  ;;  %s2121_s17 = scalar_lea.sflag [#allocation5], %s2120_s2 }
 0x215   : > { %p2790_p0 = pnand %p2802_p6, %p3972_p8 }
 0x217   : > { %p2791_p10 = pneg %p2790_p0 }
 0x219   : > { %3093 = dma.done.wait (%p2791_p10), %s2121_s17, 4096  }
 0x21a   : > { %3095 = vsyncadd (%p2791_p10), %s2121_s17, 4294963200  ;;  %s24_s23 = sadd.s32 1, %s3118_s23   ;;  %s3973_s18 = smov %s3102_s19 }
 0x21b   : > { %p21_p9 = scmp.ge.s32.totalorder %s24_s23, 34   ;;  %s3974_s19 = smov %s3106_s20 }
 0x21c   : > { %s3975_s20 = smov %s3268_s15  ;;  %s3976_s21 = smov %s3114_s22 }
 0x21d   : > { %s3977_s22 = smov %s3979_s6  ;;  %23 = sbr.rel (!%p21_p9) target bundleno = 11 (0xb), region = 117 }
 0x222   :  { %2126 = vsyncpa [#allocation4], 1 }
 0x223   :  { %2128 = vsyncpa [#allocation4 + $0x1], 1 }
 0x224   :  { %2129 = vsyncpa [#allocation7], 1 }
 0x225   :  { %2130 = vsyncpa [#allocation5], 1 }
 0x226   :  { %2132 = vsyncpa [#allocation5 + $0x1], 1 }
 0x227   :  { %2133 = vsyncpa [#allocation11], 1 }

</bundles_post_ra>
